<compile_context>
chip_gen: v7x
topology: tpu7x:2x2x1
jax: 0.10.0
libtpu: 0.0.40
codegen_flags: <defaults>
</compile_context>

<pallas_src>
import functools
import math

import jax
import jax.numpy as jnp
import numpy as np
from jax.experimental import pallas as pl
from jax.experimental.pallas import tpu as pltpu

# ------------------------- config (small, synthetic) -------------------------
N_LAYERS = 2
N_HEADS = 2
HIDDEN = 32
LN_EPS = 1e-12
INIT_RANGE = 0.02
N_NODES = 20
MAX_SEQ_LEN = 8      # L: neighbor sequence length
N_TEST_DST = 4       # T: 1 + num_negatives
BATCH = 2
LANE = 128           # lane-dense output slab width

# rows inside the packed [N_VEC_ROWS, H] parameter slab
_VROW_LAYER_BASE = 2            # rows 0,1 = embedding LayerNorm gamma/beta
_VROWS_PER_LAYER = 9            # bq bk bv bo ln1g ln1b b2 ln2g ln2b
_VROW_TAIL = _VROW_LAYER_BASE + _VROWS_PER_LAYER * N_LAYERS
N_VEC_ROWS = _VROW_TAIL + 7     # wt bt lntg lntb w_out_x w_out_t b_out


# ------------------------------ small helpers --------------------------------
def _ln(x, g, b, eps):
    mu = jnp.mean(x, axis=-1, keepdims=True)
    var = jnp.mean((x - mu) ** 2, axis=-1, keepdims=True)
    return (x - mu) * jax.lax.rsqrt(var + eps) * g + b


def _gelu(x):
    # tanh-approximate GELU (EUP-friendly inside the kernel)
    c = math.sqrt(2.0 / math.pi)
    return 0.5 * x * (1.0 + jnp.tanh(c * (x + 0.044715 * x * x * x)))


def _softmax_kernel(s):
    # kernel-only softmax: approx reciprocal goes to the (otherwise idle) EUP
    m = jnp.max(s, axis=-1, keepdims=True)
    e = jnp.exp(s - m)
    return e * pl.reciprocal(jnp.sum(e, axis=-1, keepdims=True), approx=True)


# --------------------------------- kernel ------------------------------------
def craft_kernel(rows_ref, aux_ref, wqkv_ref, wo_ref, w1b_ref, w2_ref, vecs_ref,
                 out_ref, *, n_layers, n_heads, eps):
    aux = aux_ref[...]                        # [BT, BL+1]
    bt = aux.shape[0]
    bl = aux.shape[1] - 1
    H = rows_ref.shape[-1]
    dh = H // n_heads
    scale = 1.0 / math.sqrt(dh)

    def vrow(i):                              # [1, H] row of the packed param slab
        return vecs_ref[i:i + 1, :]

    # shared self.LayerNorm on both stacked embedding streams at once
    # (rows[:BT] = test_dst embeddings, rows[BT:] = neighbor-seq embeddings;
    #  dropouts are identity in eval mode)
    xc = _ln(rows_ref[...], vrow(0), vrow(1), eps)        # [BT+BL, H]
    x = xc[:bt]                                           # evolving query stream
    ctx = xc[bt:]                                         # fixed K/V stream

    bias = aux[:, :bl]                                    # [BT, BL] additive mask
    iv = aux[:, bl:bl + 1]                                # [BT, 1]  masked intervals

    for l in range(n_layers):
        base = _VROW_LAYER_BASE + l * _VROWS_PER_LAYER
        # fused Q|K|V projection: ONE matmul on the stacked rows
        qkv = jnp.dot(xc, wqkv_ref[l], preferred_element_type=jnp.float32)  # [BT+BL, 3H]
        q = (qkv[:bt, 0:H] + vrow(base + 0)) * scale      # scale folded into q once
        k = qkv[bt:, H:2 * H] + vrow(base + 1)
        v = qkv[bt:, 2 * H:3 * H] + vrow(base + 2)
        heads = []
        for h in range(n_heads):
            sl = slice(h * dh, (h + 1) * dh)
            # contract last dims: no explicit K transpose / relayout
            s = jax.lax.dot_general(q[:, sl], k[:, sl],
                                    (((1,), (1,)), ((), ())),
                                    preferred_element_type=jnp.float32)
            p = _softmax_kernel(s + bias)
            heads.append(jnp.dot(p, v[:, sl], preferred_element_type=jnp.float32))
        attn = jnp.concatenate(heads, axis=-1)            # single-vreg lane concat
        attn = jnp.dot(attn, wo_ref[l],
                       preferred_element_type=jnp.float32) + vrow(base + 3)
        x = _ln(attn + x, vrow(base + 4), vrow(base + 5), eps)
        w1b = w1b_ref[l]                                  # [H+1, 4H]: weight + bias row
        h1 = _gelu(jnp.dot(x, w1b[:H, :],
                           preferred_element_type=jnp.float32) + w1b[H:H + 1, :])
        h2 = jnp.dot(h1, w2_ref[l],
                     preferred_element_type=jnp.float32) + vrow(base + 6)
        x = _ln(h2 + x, vrow(base + 7), vrow(base + 8), eps)
        if l + 1 < n_layers:
            xc = jnp.concatenate([x, ctx], axis=0)        # rebuild stacked rows

    # time_projection MLP (Linear(1 -> H) + ReLU) + LayerNorm_time_intervals
    t0 = _VROW_TAIL
    tfeat = jnp.maximum(iv * vrow(t0 + 0) + vrow(t0 + 1), 0.0)   # [BT, H]
    tfeat = _ln(tfeat, vrow(t0 + 2), vrow(t0 + 3), eps)

    # output_layer MLP (Linear(2H -> 1) + ReLU): concat replaced by a split
    # reduction with w_out pre-split into its x / time halves.
    logits = (jnp.sum(x * vrow(t0 + 4), axis=-1, keepdims=True)
              + jnp.sum(tfeat * vrow(t0 + 5), axis=-1, keepdims=True)
              + vrow(t0 + 6)[:, 0:1])                            # [BT, 1]
    # lane-dense output: broadcast across the 128-lane slab (unmasked vst)
    out_ref[...] = jnp.broadcast_to(jnp.maximum(logits, 0.0), out_ref.shape)


# ------------------------------ parameter init --------------------------------
def init_params(key):
    H, NL, F = HIDDEN, N_LAYERS, 4 * HIDDEN
    ks = iter(jax.random.split(key, 40))

    def nrm(shape):
        return (INIT_RANGE * jax.random.normal(next(ks), shape)).astype(jnp.float32)

    p = {}
    p['node_emb'] = nrm((N_NODES + 1, H)).at[0].set(0.0)   # padding_idx=0
    p['pos_emb'] = nrm((MAX_SEQ_LEN, H))
    p['ln_emb_g'] = 1.0 + nrm((H,)); p['ln_emb_b'] = nrm((H,))
    p['wq'] = nrm((NL, H, H)); p['bq'] = nrm((NL, H))
    p['wk'] = nrm((NL, H, H)); p['bk'] = nrm((NL, H))
    p['wv'] = nrm((NL, H, H)); p['bv'] = nrm((NL, H))
    p['wo'] = nrm((NL, H, H)); p['bo'] = nrm((NL, H))
    p['ln1g'] = 1.0 + nrm((NL, H)); p['ln1b'] = nrm((NL, H))
    p['w1'] = nrm((NL, H, F)); p['b1'] = nrm((NL, F))
    p['w2'] = nrm((NL, F, H)); p['b2'] = nrm((NL, H))
    p['ln2g'] = 1.0 + nrm((NL, H)); p['ln2b'] = nrm((NL, H))
    p['wt'] = nrm((H,)); p['bt'] = nrm((H,))
    p['lntg'] = 1.0 + nrm((H,)); p['lntb'] = nrm((H,))
    p['w_out'] = nrm((2 * H,)); p['b_out'] = nrm(())
    return p


def pack_params(p):
    """Pack the many tiny parameters into a handful of kernel operands."""
    NL, H = N_LAYERS, HIDDEN
    rows = [p['ln_emb_g'], p['ln_emb_b']]
    for l in range(NL):
        rows += [p['bq'][l], p['bk'][l], p['bv'][l], p['bo'][l],
                 p['ln1g'][l], p['ln1b'][l], p['b2'][l],
                 p['ln2g'][l], p['ln2b'][l]]
    rows += [p['wt'], p['bt'], p['lntg'], p['lntb'],
             p['w_out'][:H], p['w_out'][H:], jnp.full((H,), p['b_out'])]
    vecs = jnp.stack(rows, axis=0).astype(jnp.float32)               # [NV, H]
    assert vecs.shape[0] == N_VEC_ROWS
    return {
        'node_emb': p['node_emb'], 'pos_emb': p['pos_emb'],
        'wqkv': jnp.concatenate([p['wq'], p['wk'], p['wv']], axis=-1),  # [NL, H, 3H]
        'wo': p['wo'],
        'w1b': jnp.concatenate([p['w1'], p['b1'][:, None, :]], axis=1),  # [NL, H+1, 4H]
        'w2': p['w2'],
        'vecs': vecs,
    }


# ------------------------------ wrapper (glue) --------------------------------
@jax.jit
def craft_forward(packed, src_neighb_seq, cur_times, test_dst, dst_last_update_times):
    B, L = src_neighb_seq.shape
    T = test_dst.shape[1]
    H = HIDDEN
    BT, BL = B * T, B * L

    # --- tiny XLA glue (fused by jit): embedding gathers + operand packing ----
    inp_emb = (jnp.take(packed['node_emb'], src_neighb_seq, axis=0)
               + packed['pos_emb'][:L][None]).astype(jnp.float32)        # [B,L,H]
    dst_emb = jnp.take(packed['node_emb'], test_dst, axis=0).astype(jnp.float32)
    # single stacked row slab: [:BT] = test_dst stream, [BT:] = neighbor stream
    rows = jnp.concatenate([dst_emb.reshape(BT, H), inp_emb.reshape(BL, H)], axis=0)

    # additive attention bias: block-diagonal over the folded batch dim +
    # neighbor-padding mask, precomputed here (only BT*BL*4 bytes)
    batch_ids = jnp.arange(B, dtype=jnp.int32)
    row_ids = jnp.repeat(batch_ids, T)[:, None]                          # [BT, 1]
    col_ids = jnp.where(src_neighb_seq != 0, batch_ids[:, None],
                        jnp.int32(-1)).reshape(1, BL)                    # [1, BL]
    bias = jnp.where(row_ids == col_ids, 0.0, -10000.0).astype(jnp.float32)  # [BT, BL]

    # masked dst-last-update time intervals, precomputed (merges cur/last)
    last = dst_last_update_times.astype(jnp.float32).reshape(BT, 1)
    cur = jnp.repeat(cur_times.astype(jnp.float32), T).reshape(BT, 1)
    iv = jnp.where(last < -1.0, -100000.0, cur - last)                   # [BT, 1]

    aux = jnp.concatenate([bias, iv], axis=1)                            # [BT, BL+1]

    operands = [rows, aux, packed['wqkv'], packed['wo'],
                packed['w1b'], packed['w2'], packed['vecs']]
    in_specs = [pl.BlockSpec(op.shape, lambda i, nd=op.ndim: (0,) * nd)
                for op in operands]

    kernel = functools.partial(craft_kernel, n_layers=N_LAYERS,
                               n_heads=N_HEADS, eps=LN_EPS)
    out = pl.pallas_call(
        kernel,
        out_shape=jax.ShapeDtypeStruct((BT, LANE), jnp.float32),
        grid=(1,),                                   # no batch split across TCs
        in_specs=in_specs,
        out_specs=pl.BlockSpec((BT, LANE), lambda i: (0, 0)),
        compiler_params=pltpu.CompilerParams(dimension_semantics=("arbitrary",)),
    )(*operands)
    return out[:, 0].reshape(B, T, 1)


# --------------------------- pure-JAX reference -------------------------------
def reference_forward(params, src_neighb_seq, cur_times, test_dst, dst_last_update_times):
    B, L = src_neighb_seq.shape
    H, NH = HIDDEN, N_HEADS
    dh = H // NH
    eps = LN_EPS

    inp_emb = jnp.take(params['node_emb'], src_neighb_seq, axis=0) + params['pos_emb'][:L][None]
    dst_emb = jnp.take(params['node_emb'], test_dst, axis=0)
    mask_bias = jnp.where(src_neighb_seq != 0, 0.0, -10000.0)[:, None, :]   # [B,1,L]
    intervals = cur_times[:, None] - dst_last_update_times
    intervals = jnp.where(dst_last_update_times < -1.0, -100000.0, intervals)[..., None]

    x = _ln(dst_emb, params['ln_emb_g'], params['ln_emb_b'], eps)
    ctx = _ln(inp_emb, params['ln_emb_g'], params['ln_emb_b'], eps)
    for l in range(N_LAYERS):
        q = x @ params['wq'][l] + params['bq'][l]
        k = ctx @ params['wk'][l] + params['bk'][l]
        v = ctx @ params['wv'][l] + params['bv'][l]
        heads = []
        for h in range(NH):
            sl = slice(h * dh, (h + 1) * dh)
            s = jnp.einsum('btd,bld->btl', q[..., sl], k[..., sl]) / math.sqrt(dh) + mask_bias
            p = jax.nn.softmax(s, axis=-1)
            heads.append(jnp.einsum('btl,bld->btd', p, v[..., sl]))
        attn = jnp.concatenate(heads, axis=-1) @ params['wo'][l] + params['bo'][l]
        x = _ln(attn + x, params['ln1g'][l], params['ln1b'][l], eps)
        h1 = _gelu(x @ params['w1'][l] + params['b1'][l])
        h2 = h1 @ params['w2'][l] + params['b2'][l]
        x = _ln(h2 + x, params['ln2g'][l], params['ln2b'][l], eps)
    tfeat = jnp.maximum(intervals * params['wt'] + params['bt'], 0.0)
    tfeat = _ln(tfeat, params['lntg'], params['lntb'], eps)
    cat = jnp.concatenate([x, tfeat], axis=-1)
    logits = jnp.sum(cat * params['w_out'], axis=-1, keepdims=True) + params['b_out']
    return jnp.maximum(logits, 0.0)


# ----------------------------------- main --------------------------------------
if __name__ == "__main__":
    key = jax.random.PRNGKey(0)
    pkey, k1, k2, k3, k4 = jax.random.split(key, 5)
    params = init_params(pkey)
    packed = pack_params(params)

    src_neighb_seq = jax.random.randint(k1, (BATCH, MAX_SEQ_LEN), 0, N_NODES + 1)
    src_neighb_seq = src_neighb_seq.at[:, 0].set(1)    # at least one real neighbor
    src_neighb_seq = src_neighb_seq.at[:, -1].set(0)   # some padding
    test_dst = jax.random.randint(k2, (BATCH, N_TEST_DST), 1, N_NODES + 1)
    cur_times = jax.random.uniform(k3, (BATCH,), minval=10.0, maxval=20.0)
    dst_last_update_times = jax.random.uniform(k4, (BATCH, N_TEST_DST),
                                               minval=0.0, maxval=10.0)
    dst_last_update_times = dst_last_update_times.at[0, 1].set(-5.0)  # exercise -100000 branch

    out = craft_forward(packed, src_neighb_seq, cur_times, test_dst,
                        dst_last_update_times)
    out = jax.block_until_ready(out)

    ref = reference_forward(params, src_neighb_seq, cur_times, test_dst,
                            dst_last_update_times)
    assert out.shape == (BATCH, N_TEST_DST, 1)
    np.testing.assert_allclose(np.asarray(out), np.asarray(ref), rtol=2e-3, atol=2e-3)
    print("KERNEL_OK")
</pallas_src>

<mosaic_0001>
module attributes {stable_mosaic.version = 11 : i64} {
  func.func @craft_kernel(%arg0: i32, %arg1: memref<24x32xf32, #tpu.memory_space<vmem>>, %arg2: memref<8x17xf32, #tpu.memory_space<vmem>>, %arg3: memref<2x32x96xf32, #tpu.memory_space<vmem>>, %arg4: memref<2x32x32xf32, #tpu.memory_space<vmem>>, %arg5: memref<2x33x128xf32, #tpu.memory_space<vmem>>, %arg6: memref<2x128x32xf32, #tpu.memory_space<vmem>>, %arg7: memref<27x32xf32, #tpu.memory_space<vmem>>, %arg8: memref<8x128xf32, #tpu.memory_space<vmem>>) attributes {dimension_semantics = [#tpu.dimension_semantics<arbitrary>], iteration_bounds = array<i64: 1>, scalar_prefetch = 0 : i64, scratch_operands = 0 : i64, tpu.core_type = #tpu.core_type<tc>, window_params = [{pipeline_mode = #tpu.pipeline_mode<synchronous>, transform_indices = @transform_0, window_bounds = array<i64: 24, 32>}, {pipeline_mode = #tpu.pipeline_mode<synchronous>, transform_indices = @transform_1, window_bounds = array<i64: 8, 17>}, {pipeline_mode = #tpu.pipeline_mode<synchronous>, transform_indices = @transform_2, window_bounds = array<i64: 2, 32, 96>}, {pipeline_mode = #tpu.pipeline_mode<synchronous>, transform_indices = @transform_3, window_bounds = array<i64: 2, 32, 32>}, {pipeline_mode = #tpu.pipeline_mode<synchronous>, transform_indices = @transform_4, window_bounds = array<i64: 2, 33, 128>}, {pipeline_mode = #tpu.pipeline_mode<synchronous>, transform_indices = @transform_5, window_bounds = array<i64: 2, 128, 32>}, {pipeline_mode = #tpu.pipeline_mode<synchronous>, transform_indices = @transform_6, window_bounds = array<i64: 27, 32>}, {pipeline_mode = #tpu.pipeline_mode<synchronous>, transform_indices = @transform_7, window_bounds = array<i64: 8, 128>}]} {
    %c0 = arith.constant 0 : index
    %c0_0 = arith.constant 0 : index
    %0 = vector.load %arg2[%c0, %c0_0] : memref<8x17xf32, #tpu.memory_space<vmem>>, vector<8x17xf32>
    %c0_1 = arith.constant 0 : index
    %c0_2 = arith.constant 0 : index
    %1 = vector.load %arg1[%c0_1, %c0_2] : memref<24x32xf32, #tpu.memory_space<vmem>>, vector<24x32xf32>
    %c0_3 = arith.constant 0 : index
    %c0_4 = arith.constant 0 : index
    %2 = vector.load %arg7[%c0_3, %c0_4] : memref<27x32xf32, #tpu.memory_space<vmem>>, vector<1x32xf32>
    %c1 = arith.constant 1 : index
    %c0_5 = arith.constant 0 : index
    %3 = vector.load %arg7[%c1, %c0_5] : memref<27x32xf32, #tpu.memory_space<vmem>>, vector<1x32xf32>
    %cst = arith.constant dense<0.000000e+00> : vector<24xf32>
    %4 = vector.multi_reduction <add>, %1, %cst [1] : vector<24x32xf32> to vector<24xf32>
    %5 = vector.shape_cast %4 : vector<24xf32> to vector<24x1xf32>
    %cst_6 = arith.constant 3.200000e+01 : f32
    %6 = vector.broadcast %cst_6 : f32 to vector<24x1xf32>
    %7 = arith.divf %5, %6 : vector<24x1xf32>
    %8 = vector.broadcast %7 : vector<24x1xf32> to vector<24x32xf32>
    %9 = arith.subf %1, %8 : vector<24x32xf32>
    %10 = arith.mulf %9, %9 : vector<24x32xf32>
    %cst_7 = arith.constant dense<0.000000e+00> : vector<24xf32>
    %11 = vector.multi_reduction <add>, %10, %cst_7 [1] : vector<24x32xf32> to vector<24xf32>
    %12 = vector.shape_cast %11 : vector<24xf32> to vector<24x1xf32>
    %cst_8 = arith.constant 3.200000e+01 : f32
    %13 = vector.broadcast %cst_8 : f32 to vector<24x1xf32>
    %14 = arith.divf %12, %13 : vector<24x1xf32>
    %15 = vector.broadcast %7 : vector<24x1xf32> to vector<24x32xf32>
    %16 = arith.subf %1, %15 : vector<24x32xf32>
    %cst_9 = arith.constant 9.99999996E-13 : f32
    %17 = vector.broadcast %cst_9 : f32 to vector<24x1xf32>
    %18 = arith.addf %14, %17 : vector<24x1xf32>
    %19 = math.rsqrt %18 : vector<24x1xf32>
    %20 = vector.broadcast %19 : vector<24x1xf32> to vector<24x32xf32>
    %21 = arith.mulf %16, %20 : vector<24x32xf32>
    %22 = vector.broadcast %2 : vector<1x32xf32> to vector<24x32xf32>
    %23 = arith.mulf %21, %22 : vector<24x32xf32>
    %24 = vector.broadcast %3 : vector<1x32xf32> to vector<24x32xf32>
    %25 = arith.addf %23, %24 : vector<24x32xf32>
    %26 = vector.extract_strided_slice %25 {offsets = [0, 0], sizes = [8, 32], strides = [1, 1]} : vector<24x32xf32> to vector<8x32xf32>
    %27 = vector.extract_strided_slice %25 {offsets = [8, 0], sizes = [16, 32], strides = [1, 1]} : vector<24x32xf32> to vector<16x32xf32>
    %28 = vector.extract_strided_slice %0 {offsets = [0, 0], sizes = [8, 16], strides = [1, 1]} : vector<8x17xf32> to vector<8x16xf32>
    %29 = vector.extract_strided_slice %0 {offsets = [0, 16], sizes = [8, 1], strides = [1, 1]} : vector<8x17xf32> to vector<8x1xf32>
    %c0_10 = arith.constant 0 : index
    %c0_11 = arith.constant 0 : index
    %c0_12 = arith.constant 0 : index
    %30 = vector.load %arg3[%c0_10, %c0_11, %c0_12] : memref<2x32x96xf32, #tpu.memory_space<vmem>>, vector<1x32x96xf32>
    %31 = vector.shape_cast %30 : vector<1x32x96xf32> to vector<32x96xf32>
    %cst_13 = arith.constant dense<0.000000e+00> : vector<24x96xf32>
    %32 = tpu.matmul %25, %31, %cst_13 {dimension_numbers = #tpu.dot_dimension_numbers<[1], [0], [0], [1], [0, 0, 1, 1], [], []>} : vector<24x32xf32>, vector<32x96xf32>, vector<24x96xf32> -> vector<24x96xf32>
    %33 = vector.extract_strided_slice %32 {offsets = [0, 0], sizes = [8, 32], strides = [1, 1]} : vector<24x96xf32> to vector<8x32xf32>
    %c2 = arith.constant 2 : index
    %c0_14 = arith.constant 0 : index
    %34 = vector.load %arg7[%c2, %c0_14] : memref<27x32xf32, #tpu.memory_space<vmem>>, vector<1x32xf32>
    %35 = vector.broadcast %34 : vector<1x32xf32> to vector<8x32xf32>
    %36 = arith.addf %33, %35 : vector<8x32xf32>
    %cst_15 = arith.constant 2.500000e-01 : f32
    %37 = vector.broadcast %cst_15 : f32 to vector<8x32xf32>
    %38 = arith.mulf %36, %37 : vector<8x32xf32>
    %39 = vector.extract_strided_slice %32 {offsets = [8, 32], sizes = [16, 32], strides = [1, 1]} : vector<24x96xf32> to vector<16x32xf32>
    %c3 = arith.constant 3 : index
    %c0_16 = arith.constant 0 : index
    %40 = vector.load %arg7[%c3, %c0_16] : memref<27x32xf32, #tpu.memory_space<vmem>>, vector<1x32xf32>
    %41 = vector.broadcast %40 : vector<1x32xf32> to vector<16x32xf32>
    %42 = arith.addf %39, %41 : vector<16x32xf32>
    %43 = vector.extract_strided_slice %32 {offsets = [8, 64], sizes = [16, 32], strides = [1, 1]} : vector<24x96xf32> to vector<16x32xf32>
    %c4 = arith.constant 4 : index
    %c0_17 = arith.constant 0 : index
    %44 = vector.load %arg7[%c4, %c0_17] : memref<27x32xf32, #tpu.memory_space<vmem>>, vector<1x32xf32>
    %45 = vector.broadcast %44 : vector<1x32xf32> to vector<16x32xf32>
    %46 = arith.addf %43, %45 : vector<16x32xf32>
    %47 = vector.extract_strided_slice %38 {offsets = [0, 0], sizes = [8, 16], strides = [1, 1]} : vector<8x32xf32> to vector<8x16xf32>
    %48 = vector.extract_strided_slice %42 {offsets = [0, 0], sizes = [16, 16], strides = [1, 1]} : vector<16x32xf32> to vector<16x16xf32>
    %cst_18 = arith.constant dense<0.000000e+00> : vector<8x16xf32>
    %49 = tpu.matmul %47, %48, %cst_18 {dimension_numbers = #tpu.dot_dimension_numbers<[1], [1], [0], [0], [0, 0, 1, 0], [], []>} : vector<8x16xf32>, vector<16x16xf32>, vector<8x16xf32> -> vector<8x16xf32>
    %50 = arith.addf %49, %28 : vector<8x16xf32>
    %cst_19 = arith.constant dense<0xFF800000> : vector<8xf32>
    %51 = vector.multi_reduction <maximumf>, %50, %cst_19 [1] : vector<8x16xf32> to vector<8xf32>
    %52 = vector.shape_cast %51 : vector<8xf32> to vector<8x1xf32>
    %53 = vector.broadcast %52 : vector<8x1xf32> to vector<8x16xf32>
    %54 = arith.subf %50, %53 : vector<8x16xf32>
    %55 = math.exp %54 : vector<8x16xf32>
    %cst_20 = arith.constant dense<0.000000e+00> : vector<8xf32>
    %56 = vector.multi_reduction <add>, %55, %cst_20 [1] : vector<8x16xf32> to vector<8xf32>
    %57 = vector.shape_cast %56 : vector<8xf32> to vector<8x1xf32>
    %58 = tpu.reciprocal %57 {approx = true} : vector<8x1xf32> -> vector<8x1xf32>
    %59 = vector.broadcast %58 : vector<8x1xf32> to vector<8x16xf32>
    %60 = arith.mulf %55, %59 : vector<8x16xf32>
    %61 = vector.extract_strided_slice %46 {offsets = [0, 0], sizes = [16, 16], strides = [1, 1]} : vector<16x32xf32> to vector<16x16xf32>
    %cst_21 = arith.constant dense<0.000000e+00> : vector<8x16xf32>
    %62 = tpu.matmul %60, %61, %cst_21 {dimension_numbers = #tpu.dot_dimension_numbers<[1], [0], [0], [1], [0, 0, 1, 1], [], []>} : vector<8x16xf32>, vector<16x16xf32>, vector<8x16xf32> -> vector<8x16xf32>
    %63 = vector.extract_strided_slice %38 {offsets = [0, 16], sizes = [8, 16], strides = [1, 1]} : vector<8x32xf32> to vector<8x16xf32>
    %64 = vector.extract_strided_slice %42 {offsets = [0, 16], sizes = [16, 16], strides = [1, 1]} : vector<16x32xf32> to vector<16x16xf32>
    %cst_22 = arith.constant dense<0.000000e+00> : vector<8x16xf32>
    %65 = tpu.matmul %63, %64, %cst_22 {dimension_numbers = #tpu.dot_dimension_numbers<[1], [1], [0], [0], [0, 0, 1, 0], [], []>} : vector<8x16xf32>, vector<16x16xf32>, vector<8x16xf32> -> vector<8x16xf32>
    %66 = arith.addf %65, %28 : vector<8x16xf32>
    %cst_23 = arith.constant dense<0xFF800000> : vector<8xf32>
    %67 = vector.multi_reduction <maximumf>, %66, %cst_23 [1] : vector<8x16xf32> to vector<8xf32>
    %68 = vector.shape_cast %67 : vector<8xf32> to vector<8x1xf32>
    %69 = vector.broadcast %68 : vector<8x1xf32> to vector<8x16xf32>
    %70 = arith.subf %66, %69 : vector<8x16xf32>
    %71 = math.exp %70 : vector<8x16xf32>
    %cst_24 = arith.constant dense<0.000000e+00> : vector<8xf32>
    %72 = vector.multi_reduction <add>, %71, %cst_24 [1] : vector<8x16xf32> to vector<8xf32>
    %73 = vector.shape_cast %72 : vector<8xf32> to vector<8x1xf32>
    %74 = tpu.reciprocal %73 {approx = true} : vector<8x1xf32> -> vector<8x1xf32>
    %75 = vector.broadcast %74 : vector<8x1xf32> to vector<8x16xf32>
    %76 = arith.mulf %71, %75 : vector<8x16xf32>
    %77 = vector.extract_strided_slice %46 {offsets = [0, 16], sizes = [16, 16], strides = [1, 1]} : vector<16x32xf32> to vector<16x16xf32>
    %cst_25 = arith.constant dense<0.000000e+00> : vector<8x16xf32>
    %78 = tpu.matmul %76, %77, %cst_25 {dimension_numbers = #tpu.dot_dimension_numbers<[1], [0], [0], [1], [0, 0, 1, 1], [], []>} : vector<8x16xf32>, vector<16x16xf32>, vector<8x16xf32> -> vector<8x16xf32>
    %79 = tpu.concatenate %62, %78 in 1 : vector<8x16xf32>, vector<8x16xf32> -> vector<8x32xf32>
    %c0_26 = arith.constant 0 : index
    %c0_27 = arith.constant 0 : index
    %c0_28 = arith.constant 0 : index
    %80 = vector.load %arg4[%c0_26, %c0_27, %c0_28] : memref<2x32x32xf32, #tpu.memory_space<vmem>>, vector<1x32x32xf32>
    %81 = vector.shape_cast %80 : vector<1x32x32xf32> to vector<32x32xf32>
    %cst_29 = arith.constant dense<0.000000e+00> : vector<8x32xf32>
    %82 = tpu.matmul %79, %81, %cst_29 {dimension_numbers = #tpu.dot_dimension_numbers<[1], [0], [0], [1], [0, 0, 1, 1], [], []>} : vector<8x32xf32>, vector<32x32xf32>, vector<8x32xf32> -> vector<8x32xf32>
    %c5 = arith.constant 5 : index
    %c0_30 = arith.constant 0 : index
    %83 = vector.load %arg7[%c5, %c0_30] : memref<27x32xf32, #tpu.memory_space<vmem>>, vector<1x32xf32>
    %84 = vector.broadcast %83 : vector<1x32xf32> to vector<8x32xf32>
    %85 = arith.addf %82, %84 : vector<8x32xf32>
    %86 = arith.addf %85, %26 : vector<8x32xf32>
    %c6 = arith.constant 6 : index
    %c0_31 = arith.constant 0 : index
    %87 = vector.load %arg7[%c6, %c0_31] : memref<27x32xf32, #tpu.memory_space<vmem>>, vector<1x32xf32>
    %c7 = arith.constant 7 : index
    %c0_32 = arith.constant 0 : index
    %88 = vector.load %arg7[%c7, %c0_32] : memref<27x32xf32, #tpu.memory_space<vmem>>, vector<1x32xf32>
    %cst_33 = arith.constant dense<0.000000e+00> : vector<8xf32>
    %89 = vector.multi_reduction <add>, %86, %cst_33 [1] : vector<8x32xf32> to vector<8xf32>
    %90 = vector.shape_cast %89 : vector<8xf32> to vector<8x1xf32>
    %cst_34 = arith.constant 3.200000e+01 : f32
    %91 = vector.broadcast %cst_34 : f32 to vector<8x1xf32>
    %92 = arith.divf %90, %91 : vector<8x1xf32>
    %93 = vector.broadcast %92 : vector<8x1xf32> to vector<8x32xf32>
    %94 = arith.subf %86, %93 : vector<8x32xf32>
    %95 = arith.mulf %94, %94 : vector<8x32xf32>
    %cst_35 = arith.constant dense<0.000000e+00> : vector<8xf32>
    %96 = vector.multi_reduction <add>, %95, %cst_35 [1] : vector<8x32xf32> to vector<8xf32>
    %97 = vector.shape_cast %96 : vector<8xf32> to vector<8x1xf32>
    %cst_36 = arith.constant 3.200000e+01 : f32
    %98 = vector.broadcast %cst_36 : f32 to vector<8x1xf32>
    %99 = arith.divf %97, %98 : vector<8x1xf32>
    %100 = vector.broadcast %92 : vector<8x1xf32> to vector<8x32xf32>
    %101 = arith.subf %86, %100 : vector<8x32xf32>
    %cst_37 = arith.constant 9.99999996E-13 : f32
    %102 = vector.broadcast %cst_37 : f32 to vector<8x1xf32>
    %103 = arith.addf %99, %102 : vector<8x1xf32>
    %104 = math.rsqrt %103 : vector<8x1xf32>
    %105 = vector.broadcast %104 : vector<8x1xf32> to vector<8x32xf32>
    %106 = arith.mulf %101, %105 : vector<8x32xf32>
    %107 = vector.broadcast %87 : vector<1x32xf32> to vector<8x32xf32>
    %108 = arith.mulf %106, %107 : vector<8x32xf32>
    %109 = vector.broadcast %88 : vector<1x32xf32> to vector<8x32xf32>
    %110 = arith.addf %108, %109 : vector<8x32xf32>
    %c0_38 = arith.constant 0 : index
    %c0_39 = arith.constant 0 : index
    %c0_40 = arith.constant 0 : index
    %111 = vector.load %arg5[%c0_38, %c0_39, %c0_40] : memref<2x33x128xf32, #tpu.memory_space<vmem>>, vector<1x33x128xf32>
    %112 = vector.shape_cast %111 : vector<1x33x128xf32> to vector<33x128xf32>
    %113 = vector.extract_strided_slice %112 {offsets = [0, 0], sizes = [32, 128], strides = [1, 1]} : vector<33x128xf32> to vector<32x128xf32>
    %cst_41 = arith.constant dense<0.000000e+00> : vector<8x128xf32>
    %114 = tpu.matmul %110, %113, %cst_41 {dimension_numbers = #tpu.dot_dimension_numbers<[1], [0], [0], [1], [0, 0, 1, 1], [], []>} : vector<8x32xf32>, vector<32x128xf32>, vector<8x128xf32> -> vector<8x128xf32>
    %115 = vector.extract_strided_slice %112 {offsets = [32, 0], sizes = [1, 128], strides = [1, 1]} : vector<33x128xf32> to vector<1x128xf32>
    %116 = vector.broadcast %115 : vector<1x128xf32> to vector<8x128xf32>
    %117 = arith.addf %114, %116 : vector<8x128xf32>
    %cst_42 = arith.constant 5.000000e-01 : f32
    %118 = vector.broadcast %cst_42 : f32 to vector<8x128xf32>
    %119 = arith.mulf %118, %117 : vector<8x128xf32>
    %cst_43 = arith.constant 4.471500e-02 : f32
    %120 = vector.broadcast %cst_43 : f32 to vector<8x128xf32>
    %121 = arith.mulf %120, %117 : vector<8x128xf32>
    %122 = arith.mulf %121, %117 : vector<8x128xf32>
    %123 = arith.mulf %122, %117 : vector<8x128xf32>
    %124 = arith.addf %117, %123 : vector<8x128xf32>
    %cst_44 = arith.constant 0.797884583 : f32
    %125 = vector.broadcast %cst_44 : f32 to vector<8x128xf32>
    %126 = arith.mulf %125, %124 : vector<8x128xf32>
    %127 = math.tanh %126 : vector<8x128xf32>
    %cst_45 = arith.constant 1.000000e+00 : f32
    %128 = vector.broadcast %cst_45 : f32 to vector<8x128xf32>
    %129 = arith.addf %128, %127 : vector<8x128xf32>
    %130 = arith.mulf %119, %129 : vector<8x128xf32>
    %c0_46 = arith.constant 0 : index
    %c0_47 = arith.constant 0 : index
    %c0_48 = arith.constant 0 : index
    %131 = vector.load %arg6[%c0_46, %c0_47, %c0_48] : memref<2x128x32xf32, #tpu.memory_space<vmem>>, vector<1x128x32xf32>
    %132 = vector.shape_cast %131 : vector<1x128x32xf32> to vector<128x32xf32>
    %cst_49 = arith.constant dense<0.000000e+00> : vector<8x32xf32>
    %133 = tpu.matmul %130, %132, %cst_49 {dimension_numbers = #tpu.dot_dimension_numbers<[1], [0], [0], [1], [0, 0, 1, 1], [], []>} : vector<8x128xf32>, vector<128x32xf32>, vector<8x32xf32> -> vector<8x32xf32>
    %c8 = arith.constant 8 : index
    %c0_50 = arith.constant 0 : index
    %134 = vector.load %arg7[%c8, %c0_50] : memref<27x32xf32, #tpu.memory_space<vmem>>, vector<1x32xf32>
    %135 = vector.broadcast %134 : vector<1x32xf32> to vector<8x32xf32>
    %136 = arith.addf %133, %135 : vector<8x32xf32>
    %137 = arith.addf %136, %110 : vector<8x32xf32>
    %c9 = arith.constant 9 : index
    %c0_51 = arith.constant 0 : index
    %138 = vector.load %arg7[%c9, %c0_51] : memref<27x32xf32, #tpu.memory_space<vmem>>, vector<1x32xf32>
    %c10 = arith.constant 10 : index
    %c0_52 = arith.constant 0 : index
    %139 = vector.load %arg7[%c10, %c0_52] : memref<27x32xf32, #tpu.memory_space<vmem>>, vector<1x32xf32>
    %cst_53 = arith.constant dense<0.000000e+00> : vector<8xf32>
    %140 = vector.multi_reduction <add>, %137, %cst_53 [1] : vector<8x32xf32> to vector<8xf32>
    %141 = vector.shape_cast %140 : vector<8xf32> to vector<8x1xf32>
    %cst_54 = arith.constant 3.200000e+01 : f32
    %142 = vector.broadcast %cst_54 : f32 to vector<8x1xf32>
    %143 = arith.divf %141, %142 : vector<8x1xf32>
    %144 = vector.broadcast %143 : vector<8x1xf32> to vector<8x32xf32>
    %145 = arith.subf %137, %144 : vector<8x32xf32>
    %146 = arith.mulf %145, %145 : vector<8x32xf32>
    %cst_55 = arith.constant dense<0.000000e+00> : vector<8xf32>
    %147 = vector.multi_reduction <add>, %146, %cst_55 [1] : vector<8x32xf32> to vector<8xf32>
    %148 = vector.shape_cast %147 : vector<8xf32> to vector<8x1xf32>
    %cst_56 = arith.constant 3.200000e+01 : f32
    %149 = vector.broadcast %cst_56 : f32 to vector<8x1xf32>
    %150 = arith.divf %148, %149 : vector<8x1xf32>
    %151 = vector.broadcast %143 : vector<8x1xf32> to vector<8x32xf32>
    %152 = arith.subf %137, %151 : vector<8x32xf32>
    %cst_57 = arith.constant 9.99999996E-13 : f32
    %153 = vector.broadcast %cst_57 : f32 to vector<8x1xf32>
    %154 = arith.addf %150, %153 : vector<8x1xf32>
    %155 = math.rsqrt %154 : vector<8x1xf32>
    %156 = vector.broadcast %155 : vector<8x1xf32> to vector<8x32xf32>
    %157 = arith.mulf %152, %156 : vector<8x32xf32>
    %158 = vector.broadcast %138 : vector<1x32xf32> to vector<8x32xf32>
    %159 = arith.mulf %157, %158 : vector<8x32xf32>
    %160 = vector.broadcast %139 : vector<1x32xf32> to vector<8x32xf32>
    %161 = arith.addf %159, %160 : vector<8x32xf32>
    %162 = tpu.concatenate %161, %27 in 0 : vector<8x32xf32>, vector<16x32xf32> -> vector<24x32xf32>
    %c1_58 = arith.constant 1 : index
    %c0_59 = arith.constant 0 : index
    %c0_60 = arith.constant 0 : index
    %163 = vector.load %arg3[%c1_58, %c0_59, %c0_60] : memref<2x32x96xf32, #tpu.memory_space<vmem>>, vector<1x32x96xf32>
    %164 = vector.shape_cast %163 : vector<1x32x96xf32> to vector<32x96xf32>
    %cst_61 = arith.constant dense<0.000000e+00> : vector<24x96xf32>
    %165 = tpu.matmul %162, %164, %cst_61 {dimension_numbers = #tpu.dot_dimension_numbers<[1], [0], [0], [1], [0, 0, 1, 1], [], []>} : vector<24x32xf32>, vector<32x96xf32>, vector<24x96xf32> -> vector<24x96xf32>
    %166 = vector.extract_strided_slice %165 {offsets = [0, 0], sizes = [8, 32], strides = [1, 1]} : vector<24x96xf32> to vector<8x32xf32>
    %c11 = arith.constant 11 : index
    %c0_62 = arith.constant 0 : index
    %167 = vector.load %arg7[%c11, %c0_62] : memref<27x32xf32, #tpu.memory_space<vmem>>, vector<1x32xf32>
    %168 = vector.broadcast %167 : vector<1x32xf32> to vector<8x32xf32>
    %169 = arith.addf %166, %168 : vector<8x32xf32>
    %cst_63 = arith.constant 2.500000e-01 : f32
    %170 = vector.broadcast %cst_63 : f32 to vector<8x32xf32>
    %171 = arith.mulf %169, %170 : vector<8x32xf32>
    %172 = vector.extract_strided_slice %165 {offsets = [8, 32], sizes = [16, 32], strides = [1, 1]} : vector<24x96xf32> to vector<16x32xf32>
    %c12 = arith.constant 12 : index
    %c0_64 = arith.constant 0 : index
    %173 = vector.load %arg7[%c12, %c0_64] : memref<27x32xf32, #tpu.memory_space<vmem>>, vector<1x32xf32>
    %174 = vector.broadcast %173 : vector<1x32xf32> to vector<16x32xf32>
    %175 = arith.addf %172, %174 : vector<16x32xf32>
    %176 = vector.extract_strided_slice %165 {offsets = [8, 64], sizes = [16, 32], strides = [1, 1]} : vector<24x96xf32> to vector<16x32xf32>
    %c13 = arith.constant 13 : index
    %c0_65 = arith.constant 0 : index
    %177 = vector.load %arg7[%c13, %c0_65] : memref<27x32xf32, #tpu.memory_space<vmem>>, vector<1x32xf32>
    %178 = vector.broadcast %177 : vector<1x32xf32> to vector<16x32xf32>
    %179 = arith.addf %176, %178 : vector<16x32xf32>
    %180 = vector.extract_strided_slice %171 {offsets = [0, 0], sizes = [8, 16], strides = [1, 1]} : vector<8x32xf32> to vector<8x16xf32>
    %181 = vector.extract_strided_slice %175 {offsets = [0, 0], sizes = [16, 16], strides = [1, 1]} : vector<16x32xf32> to vector<16x16xf32>
    %cst_66 = arith.constant dense<0.000000e+00> : vector<8x16xf32>
    %182 = tpu.matmul %180, %181, %cst_66 {dimension_numbers = #tpu.dot_dimension_numbers<[1], [1], [0], [0], [0, 0, 1, 0], [], []>} : vector<8x16xf32>, vector<16x16xf32>, vector<8x16xf32> -> vector<8x16xf32>
    %183 = arith.addf %182, %28 : vector<8x16xf32>
    %cst_67 = arith.constant dense<0xFF800000> : vector<8xf32>
    %184 = vector.multi_reduction <maximumf>, %183, %cst_67 [1] : vector<8x16xf32> to vector<8xf32>
    %185 = vector.shape_cast %184 : vector<8xf32> to vector<8x1xf32>
    %186 = vector.broadcast %185 : vector<8x1xf32> to vector<8x16xf32>
    %187 = arith.subf %183, %186 : vector<8x16xf32>
    %188 = math.exp %187 : vector<8x16xf32>
    %cst_68 = arith.constant dense<0.000000e+00> : vector<8xf32>
    %189 = vector.multi_reduction <add>, %188, %cst_68 [1] : vector<8x16xf32> to vector<8xf32>
    %190 = vector.shape_cast %189 : vector<8xf32> to vector<8x1xf32>
    %191 = tpu.reciprocal %190 {approx = true} : vector<8x1xf32> -> vector<8x1xf32>
    %192 = vector.broadcast %191 : vector<8x1xf32> to vector<8x16xf32>
    %193 = arith.mulf %188, %192 : vector<8x16xf32>
    %194 = vector.extract_strided_slice %179 {offsets = [0, 0], sizes = [16, 16], strides = [1, 1]} : vector<16x32xf32> to vector<16x16xf32>
    %cst_69 = arith.constant dense<0.000000e+00> : vector<8x16xf32>
    %195 = tpu.matmul %193, %194, %cst_69 {dimension_numbers = #tpu.dot_dimension_numbers<[1], [0], [0], [1], [0, 0, 1, 1], [], []>} : vector<8x16xf32>, vector<16x16xf32>, vector<8x16xf32> -> vector<8x16xf32>
    %196 = vector.extract_strided_slice %171 {offsets = [0, 16], sizes = [8, 16], strides = [1, 1]} : vector<8x32xf32> to vector<8x16xf32>
    %197 = vector.extract_strided_slice %175 {offsets = [0, 16], sizes = [16, 16], strides = [1, 1]} : vector<16x32xf32> to vector<16x16xf32>
    %cst_70 = arith.constant dense<0.000000e+00> : vector<8x16xf32>
    %198 = tpu.matmul %196, %197, %cst_70 {dimension_numbers = #tpu.dot_dimension_numbers<[1], [1], [0], [0], [0, 0, 1, 0], [], []>} : vector<8x16xf32>, vector<16x16xf32>, vector<8x16xf32> -> vector<8x16xf32>
    %199 = arith.addf %198, %28 : vector<8x16xf32>
    %cst_71 = arith.constant dense<0xFF800000> : vector<8xf32>
    %200 = vector.multi_reduction <maximumf>, %199, %cst_71 [1] : vector<8x16xf32> to vector<8xf32>
    %201 = vector.shape_cast %200 : vector<8xf32> to vector<8x1xf32>
    %202 = vector.broadcast %201 : vector<8x1xf32> to vector<8x16xf32>
    %203 = arith.subf %199, %202 : vector<8x16xf32>
    %204 = math.exp %203 : vector<8x16xf32>
    %cst_72 = arith.constant dense<0.000000e+00> : vector<8xf32>
    %205 = vector.multi_reduction <add>, %204, %cst_72 [1] : vector<8x16xf32> to vector<8xf32>
    %206 = vector.shape_cast %205 : vector<8xf32> to vector<8x1xf32>
    %207 = tpu.reciprocal %206 {approx = true} : vector<8x1xf32> -> vector<8x1xf32>
    %208 = vector.broadcast %207 : vector<8x1xf32> to vector<8x16xf32>
    %209 = arith.mulf %204, %208 : vector<8x16xf32>
    %210 = vector.extract_strided_slice %179 {offsets = [0, 16], sizes = [16, 16], strides = [1, 1]} : vector<16x32xf32> to vector<16x16xf32>
    %cst_73 = arith.constant dense<0.000000e+00> : vector<8x16xf32>
    %211 = tpu.matmul %209, %210, %cst_73 {dimension_numbers = #tpu.dot_dimension_numbers<[1], [0], [0], [1], [0, 0, 1, 1], [], []>} : vector<8x16xf32>, vector<16x16xf32>, vector<8x16xf32> -> vector<8x16xf32>
    %212 = tpu.concatenate %195, %211 in 1 : vector<8x16xf32>, vector<8x16xf32> -> vector<8x32xf32>
    %c1_74 = arith.constant 1 : index
    %c0_75 = arith.constant 0 : index
    %c0_76 = arith.constant 0 : index
    %213 = vector.load %arg4[%c1_74, %c0_75, %c0_76] : memref<2x32x32xf32, #tpu.memory_space<vmem>>, vector<1x32x32xf32>
    %214 = vector.shape_cast %213 : vector<1x32x32xf32> to vector<32x32xf32>
    %cst_77 = arith.constant dense<0.000000e+00> : vector<8x32xf32>
    %215 = tpu.matmul %212, %214, %cst_77 {dimension_numbers = #tpu.dot_dimension_numbers<[1], [0], [0], [1], [0, 0, 1, 1], [], []>} : vector<8x32xf32>, vector<32x32xf32>, vector<8x32xf32> -> vector<8x32xf32>
    %c14 = arith.constant 14 : index
    %c0_78 = arith.constant 0 : index
    %216 = vector.load %arg7[%c14, %c0_78] : memref<27x32xf32, #tpu.memory_space<vmem>>, vector<1x32xf32>
    %217 = vector.broadcast %216 : vector<1x32xf32> to vector<8x32xf32>
    %218 = arith.addf %215, %217 : vector<8x32xf32>
    %219 = arith.addf %218, %161 : vector<8x32xf32>
    %c15 = arith.constant 15 : index
    %c0_79 = arith.constant 0 : index
    %220 = vector.load %arg7[%c15, %c0_79] : memref<27x32xf32, #tpu.memory_space<vmem>>, vector<1x32xf32>
    %c16 = arith.constant 16 : index
    %c0_80 = arith.constant 0 : index
    %221 = vector.load %arg7[%c16, %c0_80] : memref<27x32xf32, #tpu.memory_space<vmem>>, vector<1x32xf32>
    %cst_81 = arith.constant dense<0.000000e+00> : vector<8xf32>
    %222 = vector.multi_reduction <add>, %219, %cst_81 [1] : vector<8x32xf32> to vector<8xf32>
    %223 = vector.shape_cast %222 : vector<8xf32> to vector<8x1xf32>
    %cst_82 = arith.constant 3.200000e+01 : f32
    %224 = vector.broadcast %cst_82 : f32 to vector<8x1xf32>
    %225 = arith.divf %223, %224 : vector<8x1xf32>
    %226 = vector.broadcast %225 : vector<8x1xf32> to vector<8x32xf32>
    %227 = arith.subf %219, %226 : vector<8x32xf32>
    %228 = arith.mulf %227, %227 : vector<8x32xf32>
    %cst_83 = arith.constant dense<0.000000e+00> : vector<8xf32>
    %229 = vector.multi_reduction <add>, %228, %cst_83 [1] : vector<8x32xf32> to vector<8xf32>
    %230 = vector.shape_cast %229 : vector<8xf32> to vector<8x1xf32>
    %cst_84 = arith.constant 3.200000e+01 : f32
    %231 = vector.broadcast %cst_84 : f32 to vector<8x1xf32>
    %232 = arith.divf %230, %231 : vector<8x1xf32>
    %233 = vector.broadcast %225 : vector<8x1xf32> to vector<8x32xf32>
    %234 = arith.subf %219, %233 : vector<8x32xf32>
    %cst_85 = arith.constant 9.99999996E-13 : f32
    %235 = vector.broadcast %cst_85 : f32 to vector<8x1xf32>
    %236 = arith.addf %232, %235 : vector<8x1xf32>
    %237 = math.rsqrt %236 : vector<8x1xf32>
    %238 = vector.broadcast %237 : vector<8x1xf32> to vector<8x32xf32>
    %239 = arith.mulf %234, %238 : vector<8x32xf32>
    %240 = vector.broadcast %220 : vector<1x32xf32> to vector<8x32xf32>
    %241 = arith.mulf %239, %240 : vector<8x32xf32>
    %242 = vector.broadcast %221 : vector<1x32xf32> to vector<8x32xf32>
    %243 = arith.addf %241, %242 : vector<8x32xf32>
    %c1_86 = arith.constant 1 : index
    %c0_87 = arith.constant 0 : index
    %c0_88 = arith.constant 0 : index
    %244 = vector.load %arg5[%c1_86, %c0_87, %c0_88] : memref<2x33x128xf32, #tpu.memory_space<vmem>>, vector<1x33x128xf32>
    %245 = vector.shape_cast %244 : vector<1x33x128xf32> to vector<33x128xf32>
    %246 = vector.extract_strided_slice %245 {offsets = [0, 0], sizes = [32, 128], strides = [1, 1]} : vector<33x128xf32> to vector<32x128xf32>
    %cst_89 = arith.constant dense<0.000000e+00> : vector<8x128xf32>
    %247 = tpu.matmul %243, %246, %cst_89 {dimension_numbers = #tpu.dot_dimension_numbers<[1], [0], [0], [1], [0, 0, 1, 1], [], []>} : vector<8x32xf32>, vector<32x128xf32>, vector<8x128xf32> -> vector<8x128xf32>
    %248 = vector.extract_strided_slice %245 {offsets = [32, 0], sizes = [1, 128], strides = [1, 1]} : vector<33x128xf32> to vector<1x128xf32>
    %249 = vector.broadcast %248 : vector<1x128xf32> to vector<8x128xf32>
    %250 = arith.addf %247, %249 : vector<8x128xf32>
    %cst_90 = arith.constant 5.000000e-01 : f32
    %251 = vector.broadcast %cst_90 : f32 to vector<8x128xf32>
    %252 = arith.mulf %251, %250 : vector<8x128xf32>
    %cst_91 = arith.constant 4.471500e-02 : f32
    %253 = vector.broadcast %cst_91 : f32 to vector<8x128xf32>
    %254 = arith.mulf %253, %250 : vector<8x128xf32>
    %255 = arith.mulf %254, %250 : vector<8x128xf32>
    %256 = arith.mulf %255, %250 : vector<8x128xf32>
    %257 = arith.addf %250, %256 : vector<8x128xf32>
    %cst_92 = arith.constant 0.797884583 : f32
    %258 = vector.broadcast %cst_92 : f32 to vector<8x128xf32>
    %259 = arith.mulf %258, %257 : vector<8x128xf32>
    %260 = math.tanh %259 : vector<8x128xf32>
    %cst_93 = arith.constant 1.000000e+00 : f32
    %261 = vector.broadcast %cst_93 : f32 to vector<8x128xf32>
    %262 = arith.addf %261, %260 : vector<8x128xf32>
    %263 = arith.mulf %252, %262 : vector<8x128xf32>
    %c1_94 = arith.constant 1 : index
    %c0_95 = arith.constant 0 : index
    %c0_96 = arith.constant 0 : index
    %264 = vector.load %arg6[%c1_94, %c0_95, %c0_96] : memref<2x128x32xf32, #tpu.memory_space<vmem>>, vector<1x128x32xf32>
    %265 = vector.shape_cast %264 : vector<1x128x32xf32> to vector<128x32xf32>
    %cst_97 = arith.constant dense<0.000000e+00> : vector<8x32xf32>
    %266 = tpu.matmul %263, %265, %cst_97 {dimension_numbers = #tpu.dot_dimension_numbers<[1], [0], [0], [1], [0, 0, 1, 1], [], []>} : vector<8x128xf32>, vector<128x32xf32>, vector<8x32xf32> -> vector<8x32xf32>
    %c17 = arith.constant 17 : index
    %c0_98 = arith.constant 0 : index
    %267 = vector.load %arg7[%c17, %c0_98] : memref<27x32xf32, #tpu.memory_space<vmem>>, vector<1x32xf32>
    %268 = vector.broadcast %267 : vector<1x32xf32> to vector<8x32xf32>
    %269 = arith.addf %266, %268 : vector<8x32xf32>
    %270 = arith.addf %269, %243 : vector<8x32xf32>
    %c18 = arith.constant 18 : index
    %c0_99 = arith.constant 0 : index
    %271 = vector.load %arg7[%c18, %c0_99] : memref<27x32xf32, #tpu.memory_space<vmem>>, vector<1x32xf32>
    %c19 = arith.constant 19 : index
    %c0_100 = arith.constant 0 : index
    %272 = vector.load %arg7[%c19, %c0_100] : memref<27x32xf32, #tpu.memory_space<vmem>>, vector<1x32xf32>
    %cst_101 = arith.constant dense<0.000000e+00> : vector<8xf32>
    %273 = vector.multi_reduction <add>, %270, %cst_101 [1] : vector<8x32xf32> to vector<8xf32>
    %274 = vector.shape_cast %273 : vector<8xf32> to vector<8x1xf32>
    %cst_102 = arith.constant 3.200000e+01 : f32
    %275 = vector.broadcast %cst_102 : f32 to vector<8x1xf32>
    %276 = arith.divf %274, %275 : vector<8x1xf32>
    %277 = vector.broadcast %276 : vector<8x1xf32> to vector<8x32xf32>
    %278 = arith.subf %270, %277 : vector<8x32xf32>
    %279 = arith.mulf %278, %278 : vector<8x32xf32>
    %cst_103 = arith.constant dense<0.000000e+00> : vector<8xf32>
    %280 = vector.multi_reduction <add>, %279, %cst_103 [1] : vector<8x32xf32> to vector<8xf32>
    %281 = vector.shape_cast %280 : vector<8xf32> to vector<8x1xf32>
    %cst_104 = arith.constant 3.200000e+01 : f32
    %282 = vector.broadcast %cst_104 : f32 to vector<8x1xf32>
    %283 = arith.divf %281, %282 : vector<8x1xf32>
    %284 = vector.broadcast %276 : vector<8x1xf32> to vector<8x32xf32>
    %285 = arith.subf %270, %284 : vector<8x32xf32>
    %cst_105 = arith.constant 9.99999996E-13 : f32
    %286 = vector.broadcast %cst_105 : f32 to vector<8x1xf32>
    %287 = arith.addf %283, %286 : vector<8x1xf32>
    %288 = math.rsqrt %287 : vector<8x1xf32>
    %289 = vector.broadcast %288 : vector<8x1xf32> to vector<8x32xf32>
    %290 = arith.mulf %285, %289 : vector<8x32xf32>
    %291 = vector.broadcast %271 : vector<1x32xf32> to vector<8x32xf32>
    %292 = arith.mulf %290, %291 : vector<8x32xf32>
    %293 = vector.broadcast %272 : vector<1x32xf32> to vector<8x32xf32>
    %294 = arith.addf %292, %293 : vector<8x32xf32>
    %c20 = arith.constant 20 : index
    %c0_106 = arith.constant 0 : index
    %295 = vector.load %arg7[%c20, %c0_106] : memref<27x32xf32, #tpu.memory_space<vmem>>, vector<1x32xf32>
    %296 = vector.broadcast %29 : vector<8x1xf32> to vector<8x32xf32>
    %297 = vector.broadcast %295 : vector<1x32xf32> to vector<8x32xf32>
    %298 = arith.mulf %296, %297 : vector<8x32xf32>
    %c21 = arith.constant 21 : index
    %c0_107 = arith.constant 0 : index
    %299 = vector.load %arg7[%c21, %c0_107] : memref<27x32xf32, #tpu.memory_space<vmem>>, vector<1x32xf32>
    %300 = vector.broadcast %299 : vector<1x32xf32> to vector<8x32xf32>
    %301 = arith.addf %298, %300 : vector<8x32xf32>
    %cst_108 = arith.constant 0.000000e+00 : f32
    %302 = vector.broadcast %cst_108 : f32 to vector<8x32xf32>
    %303 = arith.maximumf %301, %302 : vector<8x32xf32>
    %c22 = arith.constant 22 : index
    %c0_109 = arith.constant 0 : index
    %304 = vector.load %arg7[%c22, %c0_109] : memref<27x32xf32, #tpu.memory_space<vmem>>, vector<1x32xf32>
    %c23 = arith.constant 23 : index
    %c0_110 = arith.constant 0 : index
    %305 = vector.load %arg7[%c23, %c0_110] : memref<27x32xf32, #tpu.memory_space<vmem>>, vector<1x32xf32>
    %cst_111 = arith.constant dense<0.000000e+00> : vector<8xf32>
    %306 = vector.multi_reduction <add>, %303, %cst_111 [1] : vector<8x32xf32> to vector<8xf32>
    %307 = vector.shape_cast %306 : vector<8xf32> to vector<8x1xf32>
    %cst_112 = arith.constant 3.200000e+01 : f32
    %308 = vector.broadcast %cst_112 : f32 to vector<8x1xf32>
    %309 = arith.divf %307, %308 : vector<8x1xf32>
    %310 = vector.broadcast %309 : vector<8x1xf32> to vector<8x32xf32>
    %311 = arith.subf %303, %310 : vector<8x32xf32>
    %312 = arith.mulf %311, %311 : vector<8x32xf32>
    %cst_113 = arith.constant dense<0.000000e+00> : vector<8xf32>
    %313 = vector.multi_reduction <add>, %312, %cst_113 [1] : vector<8x32xf32> to vector<8xf32>
    %314 = vector.shape_cast %313 : vector<8xf32> to vector<8x1xf32>
    %cst_114 = arith.constant 3.200000e+01 : f32
    %315 = vector.broadcast %cst_114 : f32 to vector<8x1xf32>
    %316 = arith.divf %314, %315 : vector<8x1xf32>
    %317 = vector.broadcast %309 : vector<8x1xf32> to vector<8x32xf32>
    %318 = arith.subf %303, %317 : vector<8x32xf32>
    %cst_115 = arith.constant 9.99999996E-13 : f32
    %319 = vector.broadcast %cst_115 : f32 to vector<8x1xf32>
    %320 = arith.addf %316, %319 : vector<8x1xf32>
    %321 = math.rsqrt %320 : vector<8x1xf32>
    %322 = vector.broadcast %321 : vector<8x1xf32> to vector<8x32xf32>
    %323 = arith.mulf %318, %322 : vector<8x32xf32>
    %324 = vector.broadcast %304 : vector<1x32xf32> to vector<8x32xf32>
    %325 = arith.mulf %323, %324 : vector<8x32xf32>
    %326 = vector.broadcast %305 : vector<1x32xf32> to vector<8x32xf32>
    %327 = arith.addf %325, %326 : vector<8x32xf32>
    %c24 = arith.constant 24 : index
    %c0_116 = arith.constant 0 : index
    %328 = vector.load %arg7[%c24, %c0_116] : memref<27x32xf32, #tpu.memory_space<vmem>>, vector<1x32xf32>
    %329 = vector.broadcast %328 : vector<1x32xf32> to vector<8x32xf32>
    %330 = arith.mulf %294, %329 : vector<8x32xf32>
    %cst_117 = arith.constant dense<0.000000e+00> : vector<8xf32>
    %331 = vector.multi_reduction <add>, %330, %cst_117 [1] : vector<8x32xf32> to vector<8xf32>
    %332 = vector.shape_cast %331 : vector<8xf32> to vector<8x1xf32>
    %c25 = arith.constant 25 : index
    %c0_118 = arith.constant 0 : index
    %333 = vector.load %arg7[%c25, %c0_118] : memref<27x32xf32, #tpu.memory_space<vmem>>, vector<1x32xf32>
    %334 = vector.broadcast %333 : vector<1x32xf32> to vector<8x32xf32>
    %335 = arith.mulf %327, %334 : vector<8x32xf32>
    %cst_119 = arith.constant dense<0.000000e+00> : vector<8xf32>
    %336 = vector.multi_reduction <add>, %335, %cst_119 [1] : vector<8x32xf32> to vector<8xf32>
    %337 = vector.shape_cast %336 : vector<8xf32> to vector<8x1xf32>
    %338 = arith.addf %332, %337 : vector<8x1xf32>
    %c26 = arith.constant 26 : index
    %c0_120 = arith.constant 0 : index
    %339 = vector.load %arg7[%c26, %c0_120] : memref<27x32xf32, #tpu.memory_space<vmem>>, vector<1x32xf32>
    %340 = vector.extract_strided_slice %339 {offsets = [0, 0], sizes = [1, 1], strides = [1, 1]} : vector<1x32xf32> to vector<1x1xf32>
    %341 = vector.broadcast %340 : vector<1x1xf32> to vector<8x1xf32>
    %342 = arith.addf %338, %341 : vector<8x1xf32>
    %cst_121 = arith.constant 0.000000e+00 : f32
    %343 = vector.broadcast %cst_121 : f32 to vector<8x1xf32>
    %344 = arith.maximumf %342, %343 : vector<8x1xf32>
    %345 = vector.shape_cast %344 : vector<8x1xf32> to vector<8x1xf32>
    %346 = vector.broadcast %345 : vector<8x1xf32> to vector<8x128xf32>
    %c0_122 = arith.constant 0 : index
    %c0_123 = arith.constant 0 : index
    %347 = vector.load %arg8[%c0_122, %c0_123] : memref<8x128xf32, #tpu.memory_space<vmem>>, vector<8x128xf32>
    tpu.vector_store %arg8[%c0_122, %c0_123], %346 {strides = array<i32>} : memref<8x128xf32, #tpu.memory_space<vmem>>, vector<8x128xf32>,
    return
  }
  func.func @transform_0(%arg0: i32) -> (i32, i32) {
    %c0_i32 = arith.constant 0 : i32
    %c0_i32_0 = arith.constant 0 : i32
    %c0_i32_1 = arith.constant 0 : i32
    return %c0_i32, %c0_i32_0 : i32, i32
  }
  func.func @transform_1(%arg0: i32) -> (i32, i32) {
    %c0_i32 = arith.constant 0 : i32
    %c0_i32_0 = arith.constant 0 : i32
    %c0_i32_1 = arith.constant 0 : i32
    return %c0_i32, %c0_i32_0 : i32, i32
  }
  func.func @transform_2(%arg0: i32) -> (i32, i32, i32) {
    %c0_i32 = arith.constant 0 : i32
    %c0_i32_0 = arith.constant 0 : i32
    %c0_i32_1 = arith.constant 0 : i32
    %c0_i32_2 = arith.constant 0 : i32
    return %c0_i32, %c0_i32_0, %c0_i32_1 : i32, i32, i32
  }
  func.func @transform_3(%arg0: i32) -> (i32, i32, i32) {
    %c0_i32 = arith.constant 0 : i32
    %c0_i32_0 = arith.constant 0 : i32
    %c0_i32_1 = arith.constant 0 : i32
    %c0_i32_2 = arith.constant 0 : i32
    return %c0_i32, %c0_i32_0, %c0_i32_1 : i32, i32, i32
  }
  func.func @transform_4(%arg0: i32) -> (i32, i32, i32) {
    %c0_i32 = arith.constant 0 : i32
    %c0_i32_0 = arith.constant 0 : i32
    %c0_i32_1 = arith.constant 0 : i32
    %c0_i32_2 = arith.constant 0 : i32
    return %c0_i32, %c0_i32_0, %c0_i32_1 : i32, i32, i32
  }
  func.func @transform_5(%arg0: i32) -> (i32, i32, i32) {
    %c0_i32 = arith.constant 0 : i32
    %c0_i32_0 = arith.constant 0 : i32
    %c0_i32_1 = arith.constant 0 : i32
    %c0_i32_2 = arith.constant 0 : i32
    return %c0_i32, %c0_i32_0, %c0_i32_1 : i32, i32, i32
  }
  func.func @transform_6(%arg0: i32) -> (i32, i32) {
    %c0_i32 = arith.constant 0 : i32
    %c0_i32_0 = arith.constant 0 : i32
    %c0_i32_1 = arith.constant 0 : i32
    return %c0_i32, %c0_i32_0 : i32, i32
  }
  func.func @transform_7(%arg0: i32) -> (i32, i32) {
    %c0_i32 = arith.constant 0 : i32
    %c0_i32_0 = arith.constant 0 : i32
    %c0_i32_1 = arith.constant 0 : i32
    return %c0_i32, %c0_i32_0 : i32, i32
  }
}

</mosaic_0001>

<bundles_post_ra>
// kernel: eq.11
= control target key start
LH: loop header
LB: loop body
LE: loop exit
PB: predicated region body
PF: predicated region fallthrough
CT: control target
= control target key end

     0   :  { %vm7_vm0 = vcmask 64512   ;;  %vm13_vm1 = vcmask 130112   ;;  %s39_s0 = inlined_call_operand.vmem [shape: s32[2,8], index: 0, kind: input, shape index: {}]   ;;  %s40_s1 = inlined_call_operand.vmem [shape: s32[16], index: 1, kind: output, shape index: {}]  }
   0x1   :  { %v4_v0 = vld [vmem:[%s39_s0] sm:$0x3]  ;;  %s22_s0 = smov 8  }
   0x2   :  { %5 = vst [vmem:[#allocation1] sm:$0x3] %v4_v0 }
   0x9   :  { %v10_v1 = vld [vmem:[#allocation1 + $0x1] sm:$0x1]   ;;  %v6_v2 = vld [vmem:[#allocation1] sm:$0x1]  }
   0xa   :  { %11 = vrot.lane.b32.xlu0 %v10_v1, %s22_s0  ;;  %8 = vst.msk [vmem:[#allocation0] sm:$0x1] %vm7_vm0, %v6_v2  }
  0x7c   :  { %v12_v3 = vpop.permute.xlu0 %11  }
  0x7d   :  { %14 = vst.msk [vmem:[#allocation0] sm:$0x1] %vm13_vm1, %v12_v3  }
  0x84   :  { %v18_v4 = vld [vmem:[#allocation0] sm:$0x1] }
  0x85   :  { %20 = vst [vmem:[%s40_s1] sm:$0x1] %v18_v4 }

// kernel: squeeze.1
= control target key start
LH: loop header
LB: loop body
LE: loop exit
PB: predicated region body
PF: predicated region fallthrough
CT: control target
= control target key end

     0   :  { %s85_s0 = inlined_call_operand.vmem [shape: f32[8], index: 0, kind: input, shape index: {}]   ;;  %s86_s1 = inlined_call_operand.hbm [shape: f32[2,4,1], index: 1, kind: output, shape index: {}]  }
   0x1   :  { %v5_v0 = vld [vmem:[%s85_s0] sm:$0x1] }
   0x2   :  { %2 = vsyncpa [#allocation1], 0  ;;  %6 = vst [vmem:[#allocation3] sm:$0x1] %v5_v0  ;;  %vm8_vm0 = vcmask 31744   ;;  %s58_s0 = smov 124  }
   0x3   :  { %s59_s8 = smov [#allocation0]  }
   0x4   :  { %s26_s9 = sshll.u32 %s59_s8, 4  ;;  %s27_s9 = int_to_ptr.vmem [resolvable:$true] %s26_s9 }
   0x5   :  { %s34_s10 = scalar_lea.vmem %s27_s9, 32  ;;  %p39_p1 = scmp.lt.s32.totalorder %s27_s9, %s27_s9 }
   0x6   :  { %p35_p0 = scmp.ne.s32.totalorder %s27_s9, %s34_s10  ;;  %p40_p2 = scmp.lt.s32.totalorder %s34_s10, %s34_s10 }
   0x8   :  { %p41_p3 = por %p40_p2, %p39_p1 }
   0x9   :  { %v10_v1 = vld [vmem:[#allocation3] sm:$0x1]  }
   0xa   :  { %v7_v2 = vld [vmem:[#allocation3] sm:$0x1]   ;;  %11 = vrot.lane.b32.xlu0 %v10_v1, %s58_s0  ;;  %p42_p4 = pnand %p41_p3, %p35_p0 }
   0xb   :  { %9 = vst.msk [vmem:[#allocation2] sm:$0x1] %vm8_vm0, %v7_v2  }
  0x7c   :  { %v12_v3 = vpop.permute.xlu0 %11  }
  0x7d   :  { %15 = vst.msk [vmem:[#allocation2 + $0x1] sm:$0x1] %vm8_vm0, %v12_v3  }
  0x84   :  { %v19_v4 = vld [vmem:[#allocation2] sm:$0x3] }
  0x85   :  { %21 = vst [vmem:[#allocation0] sm:$0x3] %v19_v4 }
  0x86   :  { %45 = shalt.err (!%p42_p4)
}
  0x87   :  { %s46_s13 = scalar_lea.hbm %s86_s1, 32 }
  0x88   :  { %p47_p5 = scmp.ne.s32.totalorder %s86_s1, %s46_s13  ;;  %p50_p6 = scmp.lt.u32.totalorder %s46_s13, %s86_s1 }
  0x8a   :  { %p52_p7 = pnand %p50_p6, %p47_p5 }
  0x8c   :  { %55 = shalt.err (!%p52_p7)
}
  0x8d   :  { %29 = dma.vmem_to_hbm [thread:$0]  %s27_s9, 32, %s86_s1, [#allocation1]  }
  0x8e   :  { %56 = dma.done.wait [#allocation1], 32  }
  0x8f   :  { %57 = vsyncadd [#allocation1], 4294967264 }
  0x90   :  { %31 = vsyncpa [#allocation1], 1 }

// kernel: craft_forward.1
= control target key start
LH: loop header
LB: loop body
LE: loop exit
PB: predicated region body
PF: predicated region fallthrough
CT: control target
= control target key end

     0   :  { %vm32_vm0 = vcmask 261120   ;;  %v2328_v21 = vmov 0.0|0.0   ;;  %vm2329_vm1 = vmmov 0   ;;  %v2330_v25 = vmov 0.0   ;;  %s2331_s16 = smov 32   ;;  %s2332_s23 = smov 96   ;;  %s2829_s0 = inlined_call_operand.vmem [shape: f32[24,32], index: 0, kind: input, shape index: {}]   ;;  %s2830_s2 = inlined_call_operand.vmem [shape: f32[2,32,96], index: 2, kind: input, shape index: {}]   ;;  %s2831_s6 = inlined_call_operand.vmem [shape: f32[27,32], index: 6, kind: input, shape index: {}]   ;;  %s2832_s1 = inlined_call_operand.vmem [shape: f32[8,17], index: 1, kind: input, shape index: {}]   ;;  %s2833_s3 = inlined_call_operand.vmem [shape: f32[2,32,32], index: 3, kind: input, shape index: {}]   ;;  %s2834_s4 = inlined_call_operand.vmem [shape: f32[2,33,128], index: 4, kind: input, shape index: {}]   ;;  %s2835_s5 = inlined_call_operand.vmem [shape: f32[2,128,32], index: 5, kind: input, shape index: {}]   ;;  %s2836_s7 = inlined_call_operand.vmem [shape: f32[8,128], index: 7, kind: output, shape index: {}]  }
   0x1   :  { %v27_v0 = vld [vmem:[%s2829_s0] sm:$0xff]  ;;  %v29_v1 = vld [vmem:[%s2829_s0 + $0x10] sm:$0xff]  ;;  %v28_v2 = vld [vmem:[%s2829_s0 + $0x8] sm:$0xff]  ;;  %2125 = vmatprep.subr.bf16.mxu1 %v2328_v21  ;;  %1929 = vmatprep.mubr.msk.f32.mxu1 %vm2329_vm1, %v2330_v25  ;;  %s2333_s24 = smov 80   ;;  %s2334_s25 = smov 112   ;;  %vm215_vm2 = vcmask 130048  }
   0x2   :  { %v33_v3 = vsel %vm32_vm0, %v27_v0, 0.0  ;;  %v39_v4 = vsel %vm32_vm0, %v29_v1, 0.0  ;;  %v36_v5 = vsel %vm32_vm0, %v28_v2, 0.0  ;;  %v87_v22 = vld [vmem:[%s2830_s2] sm:$0xff]  ;;  %v88_v23 = vld [vmem:[%s2830_s2 + $0x8] sm:$0xff]  ;;  %v89_v24 = vld [vmem:[%s2830_s2 + $0x10] sm:$0xff]  ;;  %2138 = vmatprep.subr.bf16.mxu0 %v2328_v21  ;;  %1956 = vmatprep.mubr.msk.f32.mxu0 %vm2329_vm1, %v2330_v25 }
   0x3   :  { %34 = vadd.xlane.f32.xlu0 %v33_v3  ;;  %40 = vadd.xlane.f32.xlu1 %v39_v4  ;;  %v2126_v26 = vpack.c.bf16 %v88_v23, %v87_v22  ;;  %v90_v27 = vld [vmem:[%s2830_s2 + $0x18] sm:$0xff]  ;;  %v1751_v29 = vld [vmem:[%s2831_s6 + $0x3] ss:$0 sm:$0xff]  ;;  %v1745_v40 = vld [vmem:[%s2831_s6] ss:$0 sm:$0xff]  ;;  %s2336_s0 = smov 48  }
   0x4   :  { %v2129_v28 = vpack.c.bf16 %v90_v27, %v89_v24  ;;  %v1746_v42 = vld [vmem:[%s2831_s6 + $0x1] ss:$0 sm:$0xff]  ;;  %v1750_v63 = vld [vmem:[%s2831_s6 + $0x2] ss:$0 sm:$0xff]  ;;  %vm2451_vm3 = vmpackc.low %vm215_vm2, %vm215_vm2  ;;  %s2337_s15 = smov 16  }
   0x5   :  { %2127 = vmatpush3.bf16.msra.mxu1 %v2126_v26  ;;  %v1752_v22 = vld [vmem:[%s2831_s6 + $0x4] ss:$0 sm:$0xff] }
   0x6   :  { %2128 = vmatprep.subr.bf16.mxu1 %v2328_v21 }
   0x7   :  { %37 = vadd.xlane.f32.xlu0 %v36_v5 }
   0x9   :  { %2130 = vmatpush3.bf16.msra.mxu1 %v2129_v28 }
   0xa   :  { %2131 = vmatprep.subr.bf16.mxu1 %v2328_v21 }
  0x90   :  { %v35_v6 = vpop.xlane.xlu0 %34  ;;  %v41_v7 = vpop.xlane.xlu1 %40 }
  0x91   :  { %v43_v8 = vmul.f32 0.03125, %v35_v6  ;;  %v45_v9 = vmul.f32 0.03125, %v41_v7 }
  0x93   :  { %v46_v10 = vsub.f32 %v27_v0, %v43_v8  ;;  %v48_v11 = vsub.f32 %v29_v1, %v45_v9 }
  0x94   :  { %v38_v12 = vpop.xlane.xlu0 %37 }
  0x95   :  { %v44_v13 = vmul.f32 0.03125, %v38_v12  ;;  %v49_v14 = vmul.f32 %v46_v10, %v46_v10  ;;  %v51_v15 = vmul.f32 %v48_v11, %v48_v11  ;;  %v2470_v12 = vld [vmem:[%s2832_s1] sm:$0xff]  ;;  %s2335_s1 = smov 64  }
  0x97   :  { %v47_v16 = vsub.f32 %v28_v2, %v44_v13  ;;  %v52_v17 = vsel %vm32_vm0, %v49_v14, 0.0  ;;  %v58_v18 = vsel %vm32_vm0, %v51_v15, 0.0 }
  0x98   :  { %53 = vadd.xlane.f32.xlu1 %v52_v17 }
  0x99   :  { %v50_v19 = vmul.f32 %v47_v16, %v47_v16 }
  0x9b   :  { %v55_v20 = vsel %vm32_vm0, %v50_v19, 0.0 }
  0x9c   :  { %59 = vadd.xlane.f32.xlu1 %v58_v18  ;;  %56 = vadd.xlane.f32.xlu0 %v55_v20 }
  0xb2   :  { %193 = vrot.lane.b32.xlu0 %v1751_v29, %s2331_s16 }
 0x125   :  { %v54_v30 = vpop.xlane.xlu1 %53 }
 0x126   :  { %v61_v31 = vmul.f32 0.03125, %v54_v30 }
 0x128   :  { %v64_v32 = vadd.f32 1e-12, %v61_v31 }
 0x129   :  { %v60_v33 = vpop.xlane.xlu1 %59  ;;  %v57_v34 = vpop.xlane.xlu0 %56 }
 0x12a   :  { %2292 = vrsqrt.f32 %v64_v32  ;;  %v63_v35 = vmul.f32 0.03125, %v60_v33  ;;  %v62_v36 = vmul.f32 0.03125, %v57_v34 }
 0x12c   :  { %v66_v37 = vadd.f32 1e-12, %v63_v35  ;;  %v65_v38 = vadd.f32 1e-12, %v62_v36 }
 0x12d   :  { %v194_v57 = vpop.permute.xlu0 %193 }
 0x12e   :  { %2294 = vrsqrt.f32 %v66_v37 }
 0x12f   :  { %2296 = vrsqrt.f32 %v65_v38 }
 0x134   :  { %v2293_v39 = vpop.eup %2292 }
 0x135   :  { %v70_v41 = vmul.f32 %v2293_v39, %v46_v10 }
 0x137   :  { %v77_v43 = vmul.f32 %v1745_v40, %v70_v41 }
 0x138   :  { %v2295_v44 = vpop.eup %2294 }
 0x139   :  { %v2297_v45 = vpop.eup %2296  ;;  %v2425_v46 = vadd.f32 %v1746_v42, %v77_v43  ;;  %v72_v48 = vmul.f32 %v2295_v44, %v48_v11 }
 0x13a   :  { %v71_v47 = vmul.f32 %v2297_v45, %v47_v16 }
 0x13b   :  { %1930 = vmatmul.mubr.msk.f32.vlgmr.msra.gmra.mrb[0].mxu1 %vm32_vm0, %v2425_v46  ;;  %v79_v51 = vmul.f32 %v1745_v40, %v72_v48 }
 0x13c   :  { %1932 = vmatprep.mubr.msk.f32.mxu1 %vm2329_vm1, %v2330_v25  ;;  %v78_v49 = vmul.f32 %v1745_v40, %v71_v47 }
 0x13d   :  { %v2437_v52 = vadd.f32 %v1746_v42, %v79_v51 }
 0x13e   :  { %v2431_v50 = vadd.f32 %v1746_v42, %v78_v49 }
 0x140   :  { %1933 = vmatmul.mubr.msk.f32.gmra.mrb[2].mxu1 %vm32_vm0, %v2431_v50 }
 0x141   :  { %1935 = vmatprep.mubr.msk.f32.mxu1 %vm2329_vm1, %v2330_v25 }
 0x144   :  { %1936 = vmatmul.mubr.msk.f32.gmra.mrb[4].mxu1 %vm32_vm0, %v2437_v52 }
 0x145   :  { %1942 = vmatprep.mubr.msk.f32.mxu1 %vm2329_vm1, %v2330_v25 }
 0x20e   :  { %v166_v53 = vpop.f32.mrb[0].mxu1 }
 0x20f   :  { %v1931_v54 = vpop.f32.mrb[1].mxu1  ;;  %v185_v0 = vadd.f32 %v1750_v63, %v166_v53 }
 0x211   :  { %v186_v1 = vmul.f32 0.25, %v185_v0 }
 0x213   :  { %v171_v55 = vpop.f32.mrb[2].mxu1 }
 0x214   :  { %v1934_v56 = vpop.f32.mrb[3].mxu1  ;;  %v196_v59 = vadd.f32 %v194_v57, %v171_v55 }
 0x215   :  { %v563_v56 = vld [vmem:[%s2833_s3 + $0x8] sm:$0xff] }
 0x217   :  { %v176_v58 = vpop.f32.mrb[4].mxu1 }
 0x218   :  { %v197_v60 = vadd.f32 %v194_v57, %v176_v58  ;;  %v1937_v61 = vpop.f32.mrb[5].mxu1  ;;  %v564_v57 = vld [vmem:[%s2833_s3 + $0x10] sm:$0xff] }
 0x21a   :  { %v2254_v62 = vpack.i.bf16 %v197_v60, %v196_v59  ;;  %v565_v59 = vld [vmem:[%s2833_s3 + $0x18] sm:$0xff] }
 0x21b   :  { %v2149_v60 = vpack.c.bf16 %v565_v59, %v564_v57  ;;  %v776_v57 = vld [vmem:[%s2835_s5 + $0x78] sm:$0xff]  ;;  %v1765_v59 = vld [vmem:[%s2834_s4 + $0x20] ss:$0 sm:$0xff] }
 0x21c   :  { %2250 = vrot.lane.b32.xlu1 %v2254_v62, %s2332_s23 }
 0x220   :  { %2255 = vrot.lane.b32.xlu1 %v2254_v62, %s2333_s24 }
 0x224   :  { %385 = vrot.lane.b32.xlu1 %v186_v1, %s2334_s25 }
 0x28e   :  { %v2251_v2 = vpop.permute.xlu1 %2250 }
 0x28f   :  { %v2253_v3 = vunpack.i.h.bf16 %v2251_v2  ;;  %v2252_v4 = vunpack.i.l.bf16 %v2251_v2 }
 0x291   :  { %v2132_v6 = vpack.c.bf16 %v2253_v3, %v2252_v4  ;;  %v1761_v3 = vld [vmem:[%s2831_s6 + $0x5] ss:$0 sm:$0xff] }
 0x292   :  { %v2256_v7 = vpop.permute.xlu1 %2255 }
 0x293   :  { %v2258_v8 = vunpack.i.h.bf16 %v2256_v7  ;;  %v2257_v9 = vunpack.i.l.bf16 %v2256_v7  ;;  %2134 = vmatpush3.bf16.xpose.msk.msra.mxu1 %vm2451_vm3, %v2132_v6 }
 0x294   :  { %2135 = vmatprep.subr.bf16.mxu1 %v2328_v21 }
 0x295   :  { %v2139_v10 = vpack.c.bf16 %v2258_v8, %v2257_v9 }
 0x296   :  { %v386_v11 = vpop.permute.xlu1 %385 }
 0x297   :  { %2141 = vmatpush3.bf16.xpose.msk.msra.mxu0 %vm2451_vm3, %v2139_v10 }
 0x298   :  { %2151 = vmatprep.subr.bf16.mxu0 %v2328_v21 }
 0x29a   :  { %1943 = vmatmul.mubr.msk.f32.vlgmr.msra.gmra.mrb[6].mxu1 %vm215_vm2, %v186_v1 }
 0x29b   :  { %1949 = vmatprep.mubr.msk.f32.mxu1 %vm2329_vm1, %v2330_v25 }
 0x29e   :  { %1957 = vmatmul.mubr.msk.f32.vlgmr.msra.gmra.mrb[0].mxu0 %vm215_vm2, %v386_v11 }
 0x29f   :  { %1985 = vmatprep.mubr.msk.f32.mxu0 %vm2329_vm1, %v2330_v25 }
 0x36d   :  { %v289_v13 = vpop.f32.mrb[6].mxu1 }
 0x36e   :  { %v290_v14 = vadd.f32 %v289_v13, %v2470_v12  ;;  %v1944_v15 = vpop.f32.mrb[7].mxu1 }
 0x370   :  { %v293_v16 = vsel %vm215_vm2, %v290_v14, -inf }
 0x371   :  { %v463_v17 = vpop.f32.mrb[0].mxu0  ;;  %294 = vmax.xlane.f32.xlu0 %v293_v16  ;;  %v670_v16 = vld [vmem:[%s2834_s4] sm:$0xff] }
 0x372   :  { %v464_v18 = vadd.f32 %v463_v17, %v2470_v12  ;;  %v1958_v19 = vpop.f32.mrb[1].mxu0  ;;  %v671_v17 = vld [vmem:[%s2834_s4 + $0x8] sm:$0xff] }
 0x373   :  { %v673_v19 = vld [vmem:[%s2834_s4 + $0x18] sm:$0xff] }
 0x374   :  { %v467_v20 = vsel %vm215_vm2, %v464_v18, -inf }
 0x375   :  { %468 = vmax.xlane.f32.xlu1 %v467_v20 }
 0x387   :  { %204 = vrot.lane.b32.xlu0 %v1752_v22, %s2335_s1  ;;  %v761_v22 = vld [vmem:[%s2835_s5] sm:$0xff] }
 0x3fe   :  { %v295_v23 = vpop.xlane.xlu0 %294 }
 0x3ff   :  { %v296_v24 = vsub.f32 %v290_v14, %v295_v23  ;;  %v762_v23 = vld [vmem:[%s2835_s5 + $0x8] sm:$0xff] }
 0x401   :  { %v297_v26 = vmul.f32 1.442695, %v296_v24  ;;  %v2158_v24 = vpack.c.bf16 %v762_v23, %v761_v22  ;;  %v1771_v22 = vld [vmem:[%s2830_s2 + $0x28] sm:$0xff] }
 0x402   :  { %v469_v27 = vpop.xlane.xlu1 %468  ;;  %v205_v28 = vpop.permute.xlu0 %204 }
 0x403   :  { %2298 = vpow2.f32 %v297_v26  ;;  %v470_v29 = vsub.f32 %v464_v18, %v469_v27  ;;  %v207_v30 = vadd.f32 %v205_v28, %v171_v55  ;;  %v208_v31 = vadd.f32 %v205_v28, %v176_v58  ;;  %v562_v55 = vld [vmem:[%s2833_s3] sm:$0xff] }
 0x404   :  { %v2146_v58 = vpack.c.bf16 %v563_v56, %v562_v55  ;;  %v2152_v18 = vpack.c.bf16 %v671_v17, %v670_v16  ;;  %v775_v56 = vld [vmem:[%s2835_s5 + $0x70] sm:$0xff] }
 0x405   :  { %v471_v32 = vmul.f32 1.442695, %v470_v29  ;;  %v2264_v33 = vpack.i.bf16 %v208_v31, %v207_v30  ;;  %v1763_v30 = vld [vmem:[%s2831_s6 + $0x6] ss:$0 sm:$0xff] }
 0x406   :  { %2153 = vmatpush3.bf16.msra.mxu0 %v2152_v18 }
 0x407   :  { %2300 = vpow2.f32 %v471_v32  ;;  %2265 = vrot.lane.b32.xlu0 %v2264_v33, %s2336_s0  ;;  %2154 = vmatprep.subr.bf16.mxu0 %v2328_v21  ;;  %v1764_v32 = vld [vmem:[%s2831_s6 + $0x7] ss:$0 sm:$0xff] }
 0x40d   :  { %v2299_v34 = vpop.eup %2298 }
 0x40e   :  { %v299_v35 = vsel %vm215_vm2, %v2299_v34, 0.0 }
 0x40f   :  { %300 = vadd.xlane.f32.xlu1 %v299_v35  ;;  %v763_v35 = vld [vmem:[%s2835_s5 + $0x10] sm:$0xff] }
 0x411   :  { %v2301_v36 = vpop.eup %2300 }
 0x412   :  { %v473_v37 = vsel %vm215_vm2, %v2301_v36, 0.0 }
 0x413   :  { %474 = vadd.xlane.f32.xlu1 %v473_v37 }
 0x424   :  { %2260 = vrot.lane.b32.xlu1 %v2264_v33, %s2335_s1 }
 0x479   :  { %v2266_v40 = vpop.permute.xlu0 %2265 }
 0x47a   :  { %v2268_v45 = vunpack.i.h.bf16 %v2266_v40  ;;  %v2267_v47 = vunpack.i.l.bf16 %v2266_v40 }
 0x47c   :  { %v2143_v53 = vpack.c.bf16 %v2268_v45, %v2267_v47  ;;  %v770_v45 = vld [vmem:[%s2835_s5 + $0x48] sm:$0xff] }
 0x49c   :  { %v301_v38 = vpop.xlane.xlu1 %300 }
 0x49d   :  { %2302 = vrcp.f32 %v301_v38  ;;  %v765_v38 = vld [vmem:[%s2835_s5 + $0x20] sm:$0xff] }
 0x4a0   :  { %v475_v39 = vpop.xlane.xlu1 %474 }
 0x4a1   :  { %2304 = vrcp.f32 %v475_v39  ;;  %v766_v39 = vld [vmem:[%s2835_s5 + $0x28] sm:$0xff] }
 0x4a2   :  { %v2164_v40 = vpack.c.bf16 %v766_v39, %v765_v38 }
 0x4a4   :  { %v2261_v41 = vpop.permute.xlu1 %2260 }
 0x4a5   :  { %v2263_v42 = vunpack.i.h.bf16 %v2261_v41  ;;  %v2262_v43 = vunpack.i.l.bf16 %v2261_v41  ;;  %v767_v41 = vld [vmem:[%s2835_s5 + $0x30] sm:$0xff] }
 0x4a7   :  { %v2303_v44 = vpop.eup %2302  ;;  %v2136_v48 = vpack.c.bf16 %v2263_v42, %v2262_v43  ;;  %v768_v42 = vld [vmem:[%s2835_s5 + $0x38] sm:$0xff] }
 0x4a8   :  { %v303_v49 = vmul.f32 %v2303_v44, %v2299_v34  ;;  %v2167_v43 = vpack.c.bf16 %v768_v42, %v767_v41  ;;  %v769_v44 = vld [vmem:[%s2835_s5 + $0x40] sm:$0xff] }
 0x4a9   :  { %2137 = vmatpush3.bf16.msra.mxu1 %v2136_v48  ;;  %v2170_v47 = vpack.c.bf16 %v770_v45, %v769_v44  ;;  %v771_v48 = vld [vmem:[%s2835_s5 + $0x50] sm:$0xff] }
 0x4aa   :  { %2142 = vmatprep.subr.bf16.mxu1 %v2328_v21 }
 0x4ab   :  { %v2305_v51 = vpop.eup %2304 }
 0x4ac   :  { %1950 = vmatmul.mubr.msk.f32.vlgmr.msra.gmra.mrb[8].mxu1 %vm215_vm2, %v303_v49  ;;  %v477_v54 = vmul.f32 %v2305_v51, %v2301_v36  ;;  %v764_v36 = vld [vmem:[%s2835_s5 + $0x18] sm:$0xff] }
 0x4ad   :  { %2144 = vmatpush3.bf16.msra.mxu1 %v2143_v53  ;;  %1963 = vmatprep.mubr.msk.f32.mxu1 %vm2329_vm1, %v2330_v25  ;;  %v2161_v37 = vpack.c.bf16 %v764_v36, %v763_v35  ;;  %v772_v49 = vld [vmem:[%s2835_s5 + $0x58] sm:$0xff]  ;;  %v773_v53 = vld [vmem:[%s2835_s5 + $0x60] sm:$0xff]  ;;  %v1769_v35 = vld [vmem:[%s2831_s6 + $0xa] ss:$0 sm:$0xff] }
 0x4ae   :  { %2145 = vmatprep.subr.bf16.mxu1 %v2328_v21  ;;  %v2173_v51 = vpack.c.bf16 %v772_v49, %v771_v48 }
 0x4b0   :  { %1964 = vmatmul.mubr.msk.f32.vlgmr.msra.gmra.mrb[10].mxu1 %vm215_vm2, %v477_v54  ;;  %v774_v54 = vld [vmem:[%s2835_s5 + $0x68] sm:$0xff] }
 0x4b1   :  { %1974 = vmatprep.mubr.msk.f32.mxu1 %vm2329_vm1, %v2330_v25  ;;  %2147 = vmatpush3.bf16.msra.mxu1 %v2146_v58  ;;  %v2176_v55 = vpack.c.bf16 %v774_v54, %v773_v53  ;;  %v2179_v58 = vpack.c.bf16 %v776_v57, %v775_v56 }
 0x4b2   :  { %2148 = vmatprep.subr.bf16.mxu1 %v2328_v21 }
 0x4b5   :  { %2150 = vmatpush3.bf16.msra.mxu1 %v2149_v60 }
 0x4b6   :  { %2157 = vmatprep.subr.bf16.mxu1 %v2328_v21 }
 0x57f   :  { %v381_v61 = vpop.f32.mrb[8].mxu1 }
 0x580   :  { %v1951_v62 = vpop.f32.mrb[9].mxu1 }
 0x583   :  { %v553_v63 = vpop.f32.mrb[10].mxu1 }
 0x584   :  { %558 = vrot.lane.b32.xlu0 %v553_v63, %s2337_s15  ;;  %v1965_v0 = vpop.f32.mrb[11].mxu1 }
 0x5f6   :  { %v559_v1 = vpop.permute.xlu0 %558 }
 0x5f7   :  { %v561_v2 = vsel %vm215_vm2, %v381_v61, %v559_v1 }
 0x5f8   :  { %1975 = vmatmul.mubr.msk.f32.vlgmr.msra.gmra.mrb[12].mxu1 %vm32_vm0, %v561_v2 }
 0x5f9   :  { %2020 = vmatprep.mubr.msk.f32.mxu1 %vm2329_vm1, %v2330_v25  ;;  %2159 = vmatpush3.bf16.msra.mxu1 %v2158_v24  ;;  %v1772_v24 = vld [vmem:[%s2830_s2 + $0x30] sm:$0xff] }
 0x5fa   :  { %2160 = vmatprep.subr.bf16.mxu1 %v2328_v21 }
 0x5fd   :  { %2162 = vmatpush3.bf16.msra.mxu1 %v2161_v37 }
 0x5fe   :  { %2163 = vmatprep.subr.bf16.mxu1 %v2328_v21 }
 0x601   :  { %2165 = vmatpush3.bf16.msra.mxu1 %v2164_v40 }
 0x602   :  { %2166 = vmatprep.subr.bf16.mxu1 %v2328_v21 }
 0x605   :  { %2168 = vmatpush3.bf16.msra.mxu1 %v2167_v43 }
 0x606   :  { %2169 = vmatprep.subr.bf16.mxu1 %v2328_v21 }
 0x609   :  { %2171 = vmatpush3.bf16.msra.mxu1 %v2170_v47 }
 0x60a   :  { %2172 = vmatprep.subr.bf16.mxu1 %v2328_v21 }
 0x60d   :  { %2174 = vmatpush3.bf16.msra.mxu1 %v2173_v51 }
 0x60e   :  { %2175 = vmatprep.subr.bf16.mxu1 %v2328_v21 }
 0x611   :  { %2177 = vmatpush3.bf16.msra.mxu1 %v2176_v55 }
 0x612   :  { %2178 = vmatprep.subr.bf16.mxu1 %v2328_v21 }
 0x615   :  { %2180 = vmatpush3.bf16.msra.mxu1 %v2179_v58 }
 0x616   :  { %2191 = vmatprep.subr.bf16.mxu1 %v2328_v21 }
 0x6cb   :  { %v640_v4 = vpop.f32.mrb[12].mxu1 }
 0x6cc   :  { %v641_v6 = vadd.f32 %v1761_v3, %v640_v4  ;;  %v1976_v7 = vpop.f32.mrb[13].mxu1 }
 0x6ce   :  { %v644_v8 = vadd.f32 %v641_v6, %v2425_v46  ;;  %v672_v46 = vld [vmem:[%s2834_s4 + $0x10] sm:$0xff] }
 0x6cf   :  { %v2155_v20 = vpack.c.bf16 %v673_v19, %v672_v46 }
 0x6d0   :  { %v647_v9 = vsel %vm32_vm0, %v644_v8, 0.0 }
 0x6d1   :  { %648 = vadd.xlane.f32.xlu0 %v647_v9  ;;  %2156 = vmatpush3.bf16.msra.mxu0 %v2155_v20  ;;  %v1767_v9 = vld [vmem:[%s2831_s6 + $0x8] ss:$0 sm:$0xff]  ;;  %v1770_v20 = vld [vmem:[%s2830_s2 + $0x20] sm:$0xff] }
 0x6d2   :  { %2181 = vmatprep.subr.bf16.mxu0 %v2328_v21  ;;  %v2182_v23 = vpack.c.bf16 %v1771_v22, %v1770_v20 }
 0x75e   :  { %v649_v10 = vpop.xlane.xlu0 %648 }
 0x75f   :  { %v650_v11 = vmul.f32 0.03125, %v649_v10 }
 0x761   :  { %v651_v13 = vsub.f32 %v644_v8, %v650_v11 }
 0x763   :  { %v652_v14 = vmul.f32 %v651_v13, %v651_v13 }
 0x765   :  { %v653_v15 = vsel %vm32_vm0, %v652_v14, 0.0 }
 0x766   :  { %654 = vadd.xlane.f32.xlu1 %v653_v15 }
 0x7f3   :  { %v655_v26 = vpop.xlane.xlu1 %654 }
 0x7f4   :  { %v656_v27 = vmul.f32 0.03125, %v655_v26  ;;  %v1773_v26 = vld [vmem:[%s2830_s2 + $0x38] sm:$0xff] }
 0x7f6   :  { %v657_v28 = vadd.f32 1e-12, %v656_v27  ;;  %v2185_v27 = vpack.c.bf16 %v1773_v26, %v1772_v24 }
 0x7f8   :  { %2306 = vrsqrt.f32 %v657_v28  ;;  %v1778_v28 = vld [vmem:[%s2831_s6 + $0xc] ss:$0 sm:$0xff] }
 0x802   :  { %v2307_v29 = vpop.eup %2306 }
 0x803   :  { %v659_v31 = vmul.f32 %v2307_v29, %v651_v13 }
 0x805   :  { %v664_v33 = vmul.f32 %v1763_v30, %v659_v31 }
 0x807   :  { %v669_v34 = vadd.f32 %v1764_v32, %v664_v33  ;;  %v1768_v33 = vld [vmem:[%s2831_s6 + $0x9] ss:$0 sm:$0xff] }
 0x809   :  { %1986 = vmatmul.mubr.msk.f32.vlgmr.msra.gmra.mrb[2].mxu0 %vm32_vm0, %v669_v34 }
 0x80a   :  { %2031 = vmatprep.mubr.msk.f32.mxu0 %vm2329_vm1, %v2330_v25  ;;  %2183 = vmatpush3.bf16.msra.mxu0 %v2182_v23 }
 0x80b   :  { %2184 = vmatprep.subr.bf16.mxu0 %v2328_v21 }
 0x80e   :  { %2186 = vmatpush3.bf16.msra.mxu0 %v2185_v27 }
 0x80f   :  { %2187 = vmatprep.subr.bf16.mxu0 %v2328_v21 }
 0x8dc   :  { %v748_v60 = vpop.f32.mrb[2].mxu0 }
 0x8dd   :  { %v749_v61 = vadd.f32 %v1765_v59, %v748_v60  ;;  %v1987_v62 = vpop.f32.mrb[3].mxu0 }
 0x8df   :  { %v753_v63 = vmul.f32 0.044715, %v749_v61  ;;  %v752_v6 = vmul.f32 0.5, %v749_v61 }
 0x8e1   :  { %v754_v0 = vmul.f32 %v753_v63, %v749_v61 }
 0x8e3   :  { %v755_v1 = vmul.f32 %v754_v0, %v749_v61 }
 0x8e5   :  { %v756_v2 = vadd.f32 %v755_v1, %v749_v61 }
 0x8e7   :  { %v757_v3 = vmul.f32 0.7978846, %v756_v2 }
 0x8e9   :  { %2308 = vtanh.f32 %v757_v3 }
 0x8f3   :  { %v2309_v4 = vpop.eup %2308 }
 0x8f4   :  { %v759_v7 = vadd.f32 1.0, %v2309_v4  ;;  %v1779_v4 = vld [vmem:[%s2831_s6 + $0xd] ss:$0 sm:$0xff] }
 0x8f6   :  { %v760_v8 = vmul.f32 %v759_v7, %v752_v6 }
 0x8f8   :  { %2021 = vmatmul.mubr.f32.vlgmr.msra.gmra.mrb[14].mxu1 %v760_v8 }
 0x8f9   :  { %2051 = vmatprep.mubr.msk.f32.mxu1 %vm2329_vm1, %v2330_v25 }
 0x9cb   :  { %v848_v10 = vpop.f32.mrb[14].mxu1 }
 0x9cc   :  { %v849_v11 = vadd.f32 %v1767_v9, %v848_v10  ;;  %v2022_v13 = vpop.f32.mrb[15].mxu1 }
 0x9ce   :  { %v852_v14 = vadd.f32 %v849_v11, %v669_v34 }
 0x9d0   :  { %v855_v15 = vsel %vm32_vm0, %v852_v14, 0.0 }
 0x9d1   :  { %856 = vadd.xlane.f32.xlu0 %v855_v15 }
 0xa5e   :  { %v857_v16 = vpop.xlane.xlu0 %856 }
 0xa5f   :  { %v858_v17 = vmul.f32 0.03125, %v857_v16 }
 0xa61   :  { %v859_v18 = vsub.f32 %v852_v14, %v858_v17 }
 0xa63   :  { %v860_v46 = vmul.f32 %v859_v18, %v859_v18 }
 0xa65   :  { %v861_v19 = vsel %vm32_vm0, %v860_v46, 0.0 }
 0xa66   :  { %862 = vadd.xlane.f32.xlu0 %v861_v19 }
 0xa7c   :  { %979 = vrot.lane.b32.xlu0 %v1778_v28, %s2331_s16 }
 0xaf3   :  { %v863_v29 = vpop.xlane.xlu0 %862 }
 0xaf4   :  { %v864_v30 = vmul.f32 0.03125, %v863_v29 }
 0xaf6   :  { %v865_v31 = vadd.f32 1e-12, %v864_v30 }
 0xaf7   :  { %v980_v42 = vpop.permute.xlu0 %979 }
 0xaf8   :  { %2310 = vrsqrt.f32 %v865_v31 }
 0xb02   :  { %v2311_v32 = vpop.eup %2310 }
 0xb03   :  { %v867_v34 = vmul.f32 %v2311_v32, %v859_v18 }
 0xb05   :  { %v872_v36 = vmul.f32 %v1768_v33, %v867_v34 }
 0xb07   :  { %v2630_v37 = vadd.f32 %v1769_v35, %v872_v36  ;;  %v1788_v36 = vld [vmem:[%s2833_s3 + $0x20] sm:$0xff] }
 0xb09   :  { %2032 = vmatmul.mubr.msk.f32.vlgmr.msra.gmra.mrb[4].mxu0 %vm32_vm0, %v2630_v37 }
 0xb0a   :  { %2034 = vmatprep.mubr.msk.f32.mxu0 %vm2329_vm1, %v2330_v25 }
 0xb0d   :  { %2035 = vmatmul.mubr.msk.f32.gmra.mrb[6].mxu0 %vm32_vm0, %v2431_v50  ;;  %v1777_v50 = vld [vmem:[%s2831_s6 + $0xb] ss:$0 sm:$0xff] }
 0xb0e   :  { %2037 = vmatprep.mubr.msk.f32.mxu0 %vm2329_vm1, %v2330_v25 }
 0xb11   :  { %2038 = vmatmul.mubr.msk.f32.gmra.mrb[8].mxu0 %vm32_vm0, %v2437_v52 }
 0xb12   :  { %2044 = vmatprep.mubr.msk.f32.mxu0 %vm2329_vm1, %v2330_v25 }
 0xbdc   :  { %v952_v38 = vpop.f32.mrb[4].mxu0 }
 0xbdd   :  { %v2033_v39 = vpop.f32.mrb[5].mxu0  ;;  %v971_v52 = vadd.f32 %v1777_v50, %v952_v38  ;;  %v1789_v38 = vld [vmem:[%s2833_s3 + $0x28] sm:$0xff] }
 0xbde   :  { %v1790_v39 = vld [vmem:[%s2833_s3 + $0x30] sm:$0xff] }
 0xbdf   :  { %v972_v49 = vmul.f32 0.25, %v971_v52  ;;  %v1792_v52 = vld [vmem:[%s2831_s6 + $0xe] ss:$0 sm:$0xff] }
 0xbe0   :  { %v957_v40 = vpop.f32.mrb[6].mxu0 }
 0xbe1   :  { %v2036_v41 = vpop.f32.mrb[7].mxu0  ;;  %v982_v44 = vadd.f32 %v980_v42, %v957_v40 }
 0xbe2   :  { %v1791_v41 = vld [vmem:[%s2833_s3 + $0x38] sm:$0xff] }
 0xbe4   :  { %v962_v43 = vpop.f32.mrb[8].mxu0 }
 0xbe5   :  { %v983_v45 = vadd.f32 %v980_v42, %v962_v43  ;;  %v2039_v47 = vpop.f32.mrb[9].mxu0  ;;  %v2205_v42 = vpack.c.bf16 %v1791_v41, %v1790_v39 }
 0xbe7   :  { %v2274_v48 = vpack.i.bf16 %v983_v45, %v982_v44 }
 0xbe9   :  { %2270 = vrot.lane.b32.xlu1 %v2274_v48, %s2332_s23 }
 0xbed   :  { %2275 = vrot.lane.b32.xlu1 %v2274_v48, %s2333_s24 }
 0xbf1   :  { %1170 = vrot.lane.b32.xlu1 %v972_v49, %s2334_s25 }
 0xc5b   :  { %v2271_v51 = vpop.permute.xlu1 %2270 }
 0xc5c   :  { %v2273_v53 = vunpack.i.h.bf16 %v2271_v51  ;;  %v2272_v54 = vunpack.i.l.bf16 %v2271_v51 }
 0xc5e   :  { %v2188_v55 = vpack.c.bf16 %v2273_v53, %v2272_v54 }
 0xc5f   :  { %v2276_v56 = vpop.permute.xlu1 %2275 }
 0xc60   :  { %2190 = vmatpush3.bf16.xpose.msk.msra.mxu0 %vm2451_vm3, %v2188_v55  ;;  %v2278_v57 = vunpack.i.h.bf16 %v2276_v56  ;;  %v2277_v58 = vunpack.i.l.bf16 %v2276_v56 }
 0xc61   :  { %2194 = vmatprep.subr.bf16.mxu0 %v2328_v21 }
 0xc62   :  { %v2195_v59 = vpack.c.bf16 %v2278_v57, %v2277_v58 }
 0xc63   :  { %v1171_v60 = vpop.permute.xlu1 %1170 }
 0xc67   :  { %2045 = vmatmul.mubr.msk.f32.vlgmr.msra.gmra.mrb[10].mxu0 %vm215_vm2, %v972_v49 }
 0xc68   :  { %2197 = vmatpush3.bf16.xpose.msk.msra.mxu0 %vm2451_vm3, %v2195_v59  ;;  %2058 = vmatprep.mubr.msk.f32.mxu0 %vm2329_vm1, %v2330_v25 }
 0xc69   :  { %2201 = vmatprep.subr.bf16.mxu0 %v2328_v21 }
 0xc6f   :  { %2059 = vmatmul.mubr.msk.f32.vlgmr.msra.gmra.mrb[12].mxu0 %vm215_vm2, %v1171_v60 }
 0xc70   :  { %2076 = vmatprep.mubr.msk.f32.mxu0 %vm2329_vm1, %v2330_v25 }
 0xd3a   :  { %v1074_v61 = vpop.f32.mrb[10].mxu0 }
 0xd3b   :  { %v1075_v62 = vadd.f32 %v1074_v61, %v2470_v12  ;;  %v2046_v63 = vpop.f32.mrb[11].mxu0  ;;  %v1797_v61 = vld [vmem:[%s2834_s4 + $0x30] sm:$0xff] }
 0xd3c   :  { %v1799_v63 = vld [vmem:[%s2834_s4 + $0x40] sm:$0xff] }
 0xd3d   :  { %v1078_v0 = vsel %vm215_vm2, %v1075_v62, -inf }
 0xd3e   :  { %1079 = vmax.xlane.f32.xlu0 %v1078_v0 }
 0xd42   :  { %v1248_v5 = vpop.f32.mrb[12].mxu0 }
 0xd43   :  { %v1249_v1 = vadd.f32 %v1248_v5, %v2470_v12  ;;  %v2060_v2 = vpop.f32.mrb[13].mxu0  ;;  %v1803_v5 = vld [vmem:[%s2835_s5 + $0x80] sm:$0xff] }
 0xd45   :  { %v1252_v3 = vsel %vm215_vm2, %v1249_v1, -inf }
 0xd46   :  { %1253 = vmax.xlane.f32.xlu1 %v1252_v3 }
 0xd54   :  { %990 = vrot.lane.b32.xlu0 %v1779_v4, %s2335_s1 }
 0xdcb   :  { %v1080_v6 = vpop.xlane.xlu0 %1079 }
 0xdcc   :  { %v1081_v7 = vsub.f32 %v1075_v62, %v1080_v6 }
 0xdce   :  { %v1082_v8 = vmul.f32 1.442695, %v1081_v7 }
 0xdcf   :  { %v991_v9 = vpop.permute.xlu0 %990 }
 0xdd0   :  { %2312 = vpow2.f32 %v1082_v8  ;;  %v993_v10 = vadd.f32 %v991_v9, %v957_v40  ;;  %v994_v11 = vadd.f32 %v991_v9, %v962_v43  ;;  %v2202_v40 = vpack.c.bf16 %v1789_v38, %v1788_v36  ;;  %v1794_v8 = vld [vmem:[%s2831_s6 + $0xf] ss:$0 sm:$0xff]  ;;  %v1801_v38 = vld [vmem:[%s2834_s4 + $0x48] ss:$0 sm:$0xff] }
 0xdd1   :  { %v2338_v36 = vmov 16  }
 0xdd2   :  { %v2284_v13 = vpack.i.bf16 %v994_v11, %v993_v10  ;;  %2203 = vmatpush3.bf16.msra.mxu0 %v2202_v40  ;;  %v1795_v10 = vld [vmem:[%s2831_s6 + $0x10] ss:$0 sm:$0xff]  ;;  %2289 = vset.pattern.permute.xlu0 %v2338_v36 }
 0xdd3   :  { %v1254_v14 = vpop.xlane.xlu1 %1253  ;;  %2204 = vmatprep.subr.bf16.mxu0 %v2328_v21 }
 0xdd4   :  { %v1255_v15 = vsub.f32 %v1249_v1, %v1254_v14  ;;  %2285 = vrot.lane.b32.xlu0 %v2284_v13, %s2336_s0  ;;  %v1804_v1 = vld [vmem:[%s2835_s5 + $0x88] sm:$0xff]  ;;  %v1805_v14 = vld [vmem:[%s2835_s5 + $0x90] sm:$0xff] }
 0xdd5   :  { %v2214_v2 = vpack.c.bf16 %v1804_v1, %v1803_v5 }
 0xdd6   :  { %v1256_v16 = vmul.f32 1.442695, %v1255_v15  ;;  %2206 = vmatpush3.bf16.msra.mxu0 %v2205_v42  ;;  %v1806_v15 = vld [vmem:[%s2835_s5 + $0x98] sm:$0xff] }
 0xdd7   :  { %2213 = vmatprep.subr.bf16.mxu0 %v2328_v21 }
 0xdd8   :  { %2314 = vpow2.f32 %v1256_v16  ;;  %v2217_v16 = vpack.c.bf16 %v1806_v15, %v1805_v14  ;;  %v1820_v15 = vld [vmem:[%s2831_s6 + $0x12] ss:$0 sm:$0xff] }
 0xdda   :  { %v2313_v17 = vpop.eup %2312 }
 0xddb   :  { %v1084_v18 = vsel %vm215_vm2, %v2313_v17, 0.0 }
 0xddc   :  { %1085 = vadd.xlane.f32.xlu1 %v1084_v18  ;;  %v1808_v18 = vld [vmem:[%s2835_s5 + $0xa8] sm:$0xff] }
 0xde2   :  { %v2315_v46 = vpop.eup %2314 }
 0xde3   :  { %v1258_v19 = vsel %vm215_vm2, %v2315_v46, 0.0 }
 0xde4   :  { %1259 = vadd.xlane.f32.xlu1 %v1258_v19  ;;  %v1809_v19 = vld [vmem:[%s2835_s5 + $0xb0] sm:$0xff] }
 0xdf5   :  { %2280 = vrot.lane.b32.xlu1 %v2284_v13, %s2335_s1 }
 0xe46   :  { %v2286_v23 = vpop.permute.xlu0 %2285 }
 0xe47   :  { %v2288_v29 = vunpack.i.h.bf16 %v2286_v23  ;;  %v2287_v30 = vunpack.i.l.bf16 %v2286_v23  ;;  %v1811_v23 = vld [vmem:[%s2835_s5 + $0xc0] sm:$0xff] }
 0xe49   :  { %v2199_v34 = vpack.c.bf16 %v2288_v29, %v2287_v30  ;;  %v1815_v30 = vld [vmem:[%s2835_s5 + $0xe0] sm:$0xff] }
 0xe69   :  { %v1086_v20 = vpop.xlane.xlu1 %1085 }
 0xe6a   :  { %2316 = vrcp.f32 %v1086_v20  ;;  %v1810_v20 = vld [vmem:[%s2835_s5 + $0xb8] sm:$0xff] }
 0xe71   :  { %v1260_v22 = vpop.xlane.xlu1 %1259 }
 0xe72   :  { %2318 = vrcp.f32 %v1260_v22  ;;  %v2223_v22 = vpack.c.bf16 %v1810_v20, %v1809_v19  ;;  %v1826_v19 = vld [vmem:[%s2831_s6 + $0x18] ss:$0 sm:$0xff]  ;;  %v1824_v20 = vld [vmem:[%s2831_s6 + $0x16] ss:$0 sm:$0xff] }
 0xe74   :  { %v2317_v28 = vpop.eup %2316 }
 0xe75   :  { %v2281_v24 = vpop.permute.xlu1 %2280  ;;  %v1088_v32 = vmul.f32 %v2317_v28, %v2313_v17  ;;  %v1807_v17 = vld [vmem:[%s2835_s5 + $0xa0] sm:$0xff]  ;;  %v1814_v28 = vld [vmem:[%s2835_s5 + $0xd8] sm:$0xff] }
 0xe76   :  { %v2283_v26 = vunpack.i.h.bf16 %v2281_v24  ;;  %v2282_v27 = vunpack.i.l.bf16 %v2281_v24  ;;  %v1812_v24 = vld [vmem:[%s2835_s5 + $0xc8] sm:$0xff] }
 0xe78   :  { %v2192_v31 = vpack.c.bf16 %v2283_v26, %v2282_v27  ;;  %v2226_v26 = vpack.c.bf16 %v1812_v24, %v1811_v23  ;;  %v1813_v27 = vld [vmem:[%s2835_s5 + $0xd0] sm:$0xff] }
 0xe79   :  { %v2229_v29 = vpack.c.bf16 %v1814_v28, %v1813_v27  ;;  %v1825_v24 = vld [vmem:[%s2831_s6 + $0x17] ss:$0 sm:$0xff]  ;;  %v1827_v28 = vld [vmem:[%s2831_s6 + $0x19] ss:$0 sm:$0xff] }
 0xe7a   :  { %2193 = vmatpush3.bf16.msra.mxu1 %v2192_v31  ;;  %v1816_v31 = vld [vmem:[%s2835_s5 + $0xe8] sm:$0xff] }
 0xe7b   :  { %2198 = vmatprep.subr.bf16.mxu1 %v2328_v21 }
 0xe7c   :  { %v2319_v33 = vpop.eup %2318 }
 0xe7d   :  { %2052 = vmatmul.mubr.msk.f32.vlgmr.msra.gmra.mrb[16].mxu1 %vm215_vm2, %v1088_v32  ;;  %v1262_v35 = vmul.f32 %v2319_v33, %v2315_v46  ;;  %v2220_v46 = vpack.c.bf16 %v1808_v18, %v1807_v17  ;;  %v2232_v32 = vpack.c.bf16 %v1816_v31, %v1815_v30  ;;  %v1817_v33 = vld [vmem:[%s2835_s5 + $0xf0] sm:$0xff] }
 0xe7e   :  { %2200 = vmatpush3.bf16.msra.mxu1 %v2199_v34  ;;  %2065 = vmatprep.mubr.msk.f32.mxu1 %vm2329_vm1, %v2330_v25  ;;  %v1818_v34 = vld [vmem:[%s2835_s5 + $0xf8] sm:$0xff]  ;;  %v1821_v17 = vld [vmem:[%s2831_s6 + $0x13] ss:$0 sm:$0xff] }
 0xe7f   :  { %2207 = vmatprep.subr.bf16.mxu1 %v2328_v21 }
 0xe81   :  { %2066 = vmatmul.mubr.msk.f32.vlgmr.msra.gmra.mrb[18].mxu1 %vm215_vm2, %v1262_v35  ;;  %v2235_v35 = vpack.c.bf16 %v1818_v34, %v1817_v33  ;;  %v2339_v33 = vmov 0  }
 0xe82   :  { %2087 = vmatprep.mubr.msk.f32.mxu1 %vm2329_vm1, %v2330_v25  ;;  %2290 = vset.pattern.permute.xlu1 %v2339_v33 }
 0xf50   :  { %v1166_v43 = vpop.f32.mrb[16].mxu1 }
 0xf51   :  { %v2053_v44 = vpop.f32.mrb[17].mxu1 }
 0xf54   :  { %v1338_v45 = vpop.f32.mrb[18].mxu1 }
 0xf55   :  { %1343 = vrot.lane.b32.xlu0 %v1338_v45, %s2337_s15  ;;  %v2067_v47 = vpop.f32.mrb[19].mxu1 }
 0xfc7   :  { %v1344_v48 = vpop.permute.xlu0 %1343 }
 0xfc8   :  { %v1346_v50 = vsel %vm215_vm2, %v1166_v43, %v1344_v48 }
 0xfc9   :  { %2077 = vmatmul.mubr.msk.f32.vlgmr.msra.gmra.mrb[14].mxu0 %vm32_vm0, %v1346_v50 }
 0xfca   :  { %2122 = vmatprep.mubr.msk.f32.mxu0 %vm2329_vm1, %v2330_v25  ;;  %v1796_v25 = vld [vmem:[%s2834_s4 + $0x28] sm:$0xff]  ;;  %2215 = vmatpush3.bf16.msra.mxu0 %v2214_v2 }
 0xfcb   :  { %v2208_v62 = vpack.c.bf16 %v1797_v61, %v1796_v25  ;;  %2216 = vmatprep.subr.bf16.mxu0 %v2328_v21 }
 0xfcd   :  { %2209 = vmatpush3.bf16.msra.mxu1 %v2208_v62 }
 0xfce   :  { %2210 = vmatprep.subr.bf16.mxu1 %v2328_v21  ;;  %2218 = vmatpush3.bf16.msra.mxu0 %v2217_v16 }
 0xfcf   :  { %2219 = vmatprep.subr.bf16.mxu0 %v2328_v21 }
 0xfd2   :  { %2221 = vmatpush3.bf16.msra.mxu0 %v2220_v46 }
 0xfd3   :  { %2222 = vmatprep.subr.bf16.mxu0 %v2328_v21 }
 0xfd6   :  { %2224 = vmatpush3.bf16.msra.mxu0 %v2223_v22 }
 0xfd7   :  { %2225 = vmatprep.subr.bf16.mxu0 %v2328_v21 }
 0xfda   :  { %2227 = vmatpush3.bf16.msra.mxu0 %v2226_v26 }
 0xfdb   :  { %2228 = vmatprep.subr.bf16.mxu0 %v2328_v21 }
 0xfde   :  { %2230 = vmatpush3.bf16.msra.mxu0 %v2229_v29 }
 0xfdf   :  { %2231 = vmatprep.subr.bf16.mxu0 %v2328_v21 }
 0xfe2   :  { %2233 = vmatpush3.bf16.msra.mxu0 %v2232_v32 }
 0xfe3   :  { %2234 = vmatprep.subr.bf16.mxu0 %v2328_v21 }
 0xfe6   :  { %2236 = vmatpush3.bf16.msra.mxu0 %v2235_v35  ;;  %v1828_v35 = vld [vmem:[%s2831_s6 + $0x1a] ss:$0 sm:$0xff] }
0x109c   :  { %v1426_v49 = vpop.f32.mrb[14].mxu0 }
0x109d   :  { %v1427_v51 = vadd.f32 %v1792_v52, %v1426_v49  ;;  %v2078_v53 = vpop.f32.mrb[15].mxu0 }
0x109e   :  { %v1823_v53 = vld [vmem:[%s2831_s6 + $0x15] ss:$0 sm:$0xff] }
0x109f   :  { %v1430_v54 = vadd.f32 %v1427_v51, %v2630_v37  ;;  %v1798_v37 = vld [vmem:[%s2834_s4 + $0x38] sm:$0xff] }
0x10a0   :  { %v2211_v0 = vpack.c.bf16 %v1799_v63, %v1798_v37 }
0x10a1   :  { %v1433_v55 = vsel %vm32_vm0, %v1430_v54, 0.0 }
0x10a2   :  { %1434 = vadd.xlane.f32.xlu0 %v1433_v55  ;;  %2212 = vmatpush3.bf16.msra.mxu1 %v2211_v0 }
0x10b8   :  { %1669 = vperm.xlu0 %2289, %v2470_v12   ;;  %v1822_v12 = vld [vmem:[%s2831_s6 + $0x14] ss:$0 sm:$0xff] }
0x10bc   :  { %2291 = vset.pattern.permute.xlu0 %v2339_v33 }
0x112f   :  { %v1435_v56 = vpop.xlane.xlu0 %1434 }
0x1130   :  { %v1436_v57 = vmul.f32 0.03125, %v1435_v56 }
0x1132   :  { %v1437_v58 = vsub.f32 %v1430_v54, %v1436_v57  ;;  %v1819_v54 = vld [vmem:[%s2831_s6 + $0x11] ss:$0 sm:$0xff] }
0x1134   :  { %v1438_v59 = vmul.f32 %v1437_v58, %v1437_v58 }
0x1136   :  { %v1439_v60 = vsel %vm32_vm0, %v1438_v59, 0.0 }
0x1137   :  { %1440 = vadd.xlane.f32.xlu1 %v1439_v60  ;;  %v1670_v49 = vpop.permute.xlu0 %1669 }
0x1138   :  { %v1676_v51 = vmul.f32 %v1822_v12, %v1670_v49 }
0x113a   :  { %v1682_v55 = vadd.f32 %v1823_v53, %v1676_v51 }
0x113c   :  { %v1683_v60 = vmax.f32 %v1682_v55, 0.0 }
0x113e   :  { %v1686_v61 = vsel %vm32_vm0, %v1683_v60, 0.0 }
0x11c4   :  { %v1441_v3 = vpop.xlane.xlu1 %1440 }
0x11c5   :  { %v1442_v4 = vmul.f32 0.03125, %v1441_v3 }
0x11c7   :  { %v1443_v6 = vadd.f32 1e-12, %v1442_v4 }
0x11c9   :  { %2320 = vrsqrt.f32 %v1443_v6 }
0x11d3   :  { %v2321_v7 = vpop.eup %2320 }
0x11d4   :  { %v1445_v9 = vmul.f32 %v2321_v7, %v1437_v58 }
0x11d6   :  { %v1450_v11 = vmul.f32 %v1794_v8, %v1445_v9 }
0x11d8   :  { %v2733_v13 = vadd.f32 %v1795_v10, %v1450_v11 }
0x11da   :  { %2088 = vmatmul.mubr.msk.f32.vlgmr.msra.gmra.mrb[20].mxu1 %vm32_vm0, %v2733_v13 }
0x12ad   :  { %v1535_v39 = vpop.f32.mrb[20].mxu1 }
0x12ae   :  { %v1536_v40 = vadd.f32 %v1801_v38, %v1535_v39  ;;  %v2089_v41 = vpop.f32.mrb[21].mxu1 }
0x12b0   :  { %v1540_v42 = vmul.f32 0.044715, %v1536_v40  ;;  %v1539_v21 = vmul.f32 0.5, %v1536_v40 }
0x12b2   :  { %v1541_v43 = vmul.f32 %v1540_v42, %v1536_v40 }
0x12b4   :  { %v1542_v44 = vmul.f32 %v1541_v43, %v1536_v40 }
0x12b6   :  { %v1543_v45 = vadd.f32 %v1542_v44, %v1536_v40 }
0x12b8   :  { %v1544_v47 = vmul.f32 0.7978846, %v1543_v45 }
0x12ba   :  { %2322 = vtanh.f32 %v1544_v47 }
0x12c4   :  { %v2323_v48 = vpop.eup %2322 }
0x12c5   :  { %v1546_v50 = vadd.f32 1.0, %v2323_v48 }
0x12c7   :  { %v1547_v52 = vmul.f32 %v1546_v50, %v1539_v21 }
0x12c9   :  { %2123 = vmatmul.mubr.f32.vlgmr.msra.gmra.mrb[16].mxu0 %v1547_v52 }
0x139c   :  { %v1636_v56 = vpop.f32.mrb[16].mxu0 }
0x139d   :  { %v1637_v57 = vadd.f32 %v1819_v54, %v1636_v56  ;;  %v2124_v58 = vpop.f32.mrb[17].mxu0 }
0x139f   :  { %v1640_v59 = vadd.f32 %v1637_v57, %v2733_v13 }
0x13a1   :  { %v1643_v25 = vsel %vm32_vm0, %v1640_v59, 0.0 }
0x13a2   :  { %1644 = vadd.xlane.f32.xlu1 %v1643_v25 }
0x13a6   :  { %1687 = vadd.xlane.f32.xlu1 %v1686_v61 }
0x142f   :  { %v1645_v62 = vpop.xlane.xlu1 %1644 }
0x1430   :  { %v1646_v37 = vmul.f32 0.03125, %v1645_v62 }
0x1432   :  { %v1647_v63 = vsub.f32 %v1640_v59, %v1646_v37 }
0x1433   :  { %v1688_v0 = vpop.xlane.xlu1 %1687 }
0x1434   :  { %v1689_v5 = vmul.f32 0.03125, %v1688_v0  ;;  %v1648_v1 = vmul.f32 %v1647_v63, %v1647_v63 }
0x1436   :  { %v1690_v2 = vsub.f32 %v1683_v60, %v1689_v5  ;;  %v1649_v3 = vsel %vm32_vm0, %v1648_v1, 0.0 }
0x1437   :  { %1650 = vadd.xlane.f32.xlu1 %v1649_v3 }
0x1438   :  { %v1691_v4 = vmul.f32 %v1690_v2, %v1690_v2 }
0x143a   :  { %v1692_v6 = vsel %vm32_vm0, %v1691_v4, 0.0 }
0x143b   :  { %1693 = vadd.xlane.f32.xlu1 %v1692_v6 }
0x14c4   :  { %v1651_v7 = vpop.xlane.xlu1 %1650 }
0x14c5   :  { %v1652_v8 = vmul.f32 0.03125, %v1651_v7 }
0x14c7   :  { %v1653_v9 = vadd.f32 1e-12, %v1652_v8 }
0x14c8   :  { %v1694_v10 = vpop.xlane.xlu1 %1693 }
0x14c9   :  { %2324 = vrsqrt.f32 %v1653_v9  ;;  %v1695_v11 = vmul.f32 0.03125, %v1694_v10 }
0x14cb   :  { %v1696_v13 = vadd.f32 1e-12, %v1695_v11 }
0x14cd   :  { %2326 = vrsqrt.f32 %v1696_v13 }
0x14d3   :  { %v2325_v14 = vpop.eup %2324 }
0x14d4   :  { %v1655_v16 = vmul.f32 %v2325_v14, %v1647_v63 }
0x14d6   :  { %v1660_v18 = vmul.f32 %v1820_v15, %v1655_v16 }
0x14d7   :  { %v2327_v46 = vpop.eup %2326 }
0x14d8   :  { %v1665_v22 = vadd.f32 %v1821_v17, %v1660_v18  ;;  %v1698_v23 = vmul.f32 %v2327_v46, %v1690_v2 }
0x14da   :  { %v1714_v26 = vmul.f32 %v1826_v19, %v1665_v22  ;;  %v1703_v27 = vmul.f32 %v1824_v20, %v1698_v23 }
0x14dc   :  { %v1715_v29 = vsel %vm32_vm0, %v1714_v26, 0.0  ;;  %v1708_v30 = vadd.f32 %v1825_v24, %v1703_v27 }
0x14dd   :  { %1716 = vadd.xlane.f32.xlu1 %v1715_v29 }
0x14de   :  { %v1723_v31 = vmul.f32 %v1827_v28, %v1708_v30 }
0x14e0   :  { %v1724_v32 = vsel %vm32_vm0, %v1723_v31, 0.0 }
0x14e1   :  { %1725 = vadd.xlane.f32.xlu1 %v1724_v32 }
0x156a   :  { %v1717_v34 = vpop.xlane.xlu1 %1716 }
0x156e   :  { %v1726_v36 = vpop.xlane.xlu1 %1725 }
0x156f   :  { %v1727_v38 = vadd.f32 %v1726_v36, %v1717_v34 }
0x1571   :  { %v1733_v39 = vadd.f32 %v1828_v35, %v1727_v38 }
0x1573   :  { %v1734_v40 = vmax.f32 %v1733_v39, 0.0 }
0x1575   :  { %1737 = vperm.xlu1 %2290, %v1734_v40  }
0x15f4   :  { %v1738_v41 = vpop.permute.xlu1 %1737 }
0x15f5   :  { %1740 = vst [vmem:[%s2836_s7] sm:$0xff] %v1738_v41 }

</bundles_post_ra>
